<compile_context>
chip_gen: v5e
topology: v5e:2x2
jax: 0.10.0
libtpu: 0.0.40
codegen_flags: <defaults>
</compile_context>

<pallas_src>
import jax
import jax.numpy as jnp
from jax.experimental import pallas as pl
from jax.experimental.pallas import tpu as pltpu


# ---------------------------------------------------------------------------
# Fused forward kernel (one grid step == one batch element, all layers)
# ---------------------------------------------------------------------------

def _make_fused_kernel(L1, L2, L3):
  """Builds the fused kernel; L1/L2/L3 are the static layer output lengths."""

  def conv(src_ref, w_ref, b_ref, *, K, stride, L_out, relu, residual=None):
    """Conv1d over a row-padded f32 scratch ref as ONE bf16 MXU matmul.

    Taps come straight from VMEM (strided reads when stride > 1) and are
    concatenated along lanes: (L_out, K*C_in) @ (K*C_in, C_out). BatchNorm is
    pre-folded into w/b; the elementwise tail stays in f32.
    """
    taps = []
    for k in range(K):                       # K in {1, 3, 5}: static unroll
      if stride == 1:
        taps.append(src_ref[pl.ds(k, L_out), :])
      else:
        taps.append(src_ref[pl.ds(k, L_out, stride=stride), :])
    x = taps[0] if K == 1 else jnp.concatenate(taps, axis=-1)
    y = jnp.dot(x.astype(jnp.bfloat16), w_ref[...],
                preferred_element_type=jnp.float32)
    y = y + b_ref[...]                       # folded-BN bias (f32)
    if residual is not None:
      y = y + residual
    if relu:
      y = jnp.maximum(y, 0.0)
    return y

  def kernel(x_ref,
             stem_w, stem_b,
             a_c1w, a_c1b, a_c2w, a_c2b,
             b_c1w, b_c1b, b_c2w, b_c2b,
             d_w, c_c1w, c_c1b, c_c2w, c_c2b,
             e_c1w, e_c1b, e_c2w, e_c2b,
             fc_w, fc_b,
             out_ref,
             xs, h1p, h2p, t64, y1a, y1b, t128, y2a):
    # Zero ONLY the single pad row at each end of every row-padded scratch
    # buffer. The bodies (rows [1, 1+L_body)) are always fully overwritten
    # before being read, so whole-buffer zero-fills are unnecessary.
    for buf in (h1p, h2p, t64, y1a, y1b, t128, y2a):
      zrow = jnp.zeros((1, buf.shape[1]), buf.dtype)
      buf[pl.ds(0, 1), :] = zrow
      buf[pl.ds(buf.shape[0] - 1, 1), :] = zrow

    def store_body(dst_ref, val):
      """Store `val` at rows [1, 1+rows); pad rows already zeroed above."""
      dst_ref[pl.ds(1, val.shape[0]), :] = val

    # Stage this batch element's padded input into a 2-D scratch so every
    # conv tap below is a plain (optionally strided) 2-D VMEM read.
    xs[...] = x_ref[0]

    # --- stem: conv(k=5, s=2, p=2) + folded BN + relu ----------------------
    h1 = conv(xs, stem_w, stem_b, K=5, stride=2, L_out=L1, relu=True)
    # Zero row-padding is equivalent to -inf maxpool padding here: h1 >= 0
    # (post-ReLU) and every pool window contains at least one real element.
    store_body(h1p, h1)

    # --- maxpool(k=3, s=2, p=1) --------------------------------------------
    p0 = h1p[pl.ds(0, L2, stride=2), :]
    p1 = h1p[pl.ds(1, L2, stride=2), :]
    p2 = h1p[pl.ds(2, L2, stride=2), :]
    store_body(h2p, jnp.maximum(jnp.maximum(p0, p1), p2))

    # --- layer1a (64 -> 64, stride 1, identity residual) --------------------
    store_body(t64, conv(h2p, a_c1w, a_c1b, K=3, stride=1, L_out=L2,
                         relu=True))
    res = h2p[pl.ds(1, L2), :]
    store_body(y1a, conv(t64, a_c2w, a_c2b, K=3, stride=1, L_out=L2,
                         relu=True, residual=res))

    # --- layer1b (64 -> 64, stride 1, identity residual) --------------------
    store_body(t64, conv(y1a, b_c1w, b_c1b, K=3, stride=1, L_out=L2,
                         relu=True))
    res = y1a[pl.ds(1, L2), :]
    store_body(y1b, conv(t64, b_c2w, b_c2b, K=3, stride=1, L_out=L2,
                         relu=True, residual=res))

    # --- layer2a (64 -> 128, stride 2); fused 1x1 stride-2 downsample -------
    # (Conv1d only, no BN, matching the module's _make_layer exactly.)
    res = jnp.dot(y1b[pl.ds(1, L3, stride=2), :].astype(jnp.bfloat16),
                  d_w[...], preferred_element_type=jnp.float32)
    store_body(t128, conv(y1b, c_c1w, c_c1b, K=3, stride=2, L_out=L3,
                          relu=True))
    store_body(y2a, conv(t128, c_c2w, c_c2b, K=3, stride=1, L_out=L3,
                         relu=True, residual=res))

    # --- layer2b (128 -> 128, stride 1, identity residual) ------------------
    store_body(t128, conv(y2a, e_c1w, e_c1b, K=3, stride=1, L_out=L3,
                          relu=True))
    res = y2a[pl.ds(1, L3), :]
    y = conv(t128, e_c2w, e_c2b, K=3, stride=1, L_out=L3, relu=True,
             residual=res)

    # --- head: adaptive avg pool (mean over L) + fc, lane-dense output ------
    pooled = jnp.mean(y, axis=0, keepdims=True)                 # (1, 128) f32
    logits = jnp.dot(pooled.astype(jnp.bfloat16), fc_w[...],
                     preferred_element_type=jnp.float32) + fc_b[...]
    out_ref[0] = logits

  return kernel


# ---------------------------------------------------------------------------
# Weight preparation (BN folding, layout, bf16 cast) and wrapper
# ---------------------------------------------------------------------------

def _fold_conv_bn(w, gamma, beta, mean, var, eps=1e-5):
  """PyTorch (C_out, C_in, K) conv weight + BN -> (K*C_in, C_out) bf16, (1, C_out) f32."""
  c_out, c_in, k = w.shape
  scale = gamma / jnp.sqrt(var + eps)
  w2 = jnp.transpose(w, (2, 1, 0)).reshape(k * c_in, c_out) * scale[None, :]
  b2 = (beta - mean * scale).reshape(1, c_out)
  return w2.astype(jnp.bfloat16), b2.astype(jnp.float32)


def _plain_conv_w(w):
  """PyTorch (C_out, C_in, K) conv weight (no BN) -> (K*C_in, C_out) bf16."""
  c_out, c_in, k = w.shape
  return jnp.transpose(w, (2, 1, 0)).reshape(k * c_in, c_out).astype(jnp.bfloat16)


def _prep_block(p):
  w1, b1 = _fold_conv_bn(p["conv1_w"], p["bn1_gamma"], p["bn1_beta"],
                         p["bn1_mean"], p["bn1_var"])
  w2, b2 = _fold_conv_bn(p["conv2_w"], p["bn2_gamma"], p["bn2_beta"],
                         p["bn2_mean"], p["bn2_var"])
  return w1, b1, w2, b2


@jax.jit
def resnet1d_small_forward(x_ncl, params):
  """x_ncl: (N, C, L) like PyTorch. Returns (N, num_classes) f32 logits."""
  N, c_in, L = x_ncl.shape
  num_classes = params["fc_w"].shape[0]
  c_fc = params["fc_w"].shape[1]

  # Static output lengths (PyTorch conv/pool arithmetic).
  L1 = (L + 2 * 2 - 5) // 2 + 1            # stem conv k=5 s=2 p=2
  L2 = (L1 + 2 * 1 - 3) // 2 + 1           # maxpool  k=3 s=2 p=1
  L3 = (L2 + 2 * 1 - 3) // 2 + 1           # layer2a convs, stride 2

  # NCL -> NLC; pad L once by the stem's padding (tiny, done in HBM).
  x = jnp.transpose(x_ncl, (0, 2, 1)).astype(jnp.float32)
  x_pad = jnp.pad(x, ((0, 0), (2, 2), (0, 0)))

  # Fold BatchNorm into weights/bias; bf16 weights for the MXU.
  stem_w, stem_b = _fold_conv_bn(params["conv1_w"], params["bn1_gamma"],
                                 params["bn1_beta"], params["bn1_mean"],
                                 params["bn1_var"])
  a_w = _prep_block(params["layer1a"])
  b_w = _prep_block(params["layer1b"])
  c_w = _prep_block(params["layer2a"])
  e_w = _prep_block(params["layer2b"])
  d_w = _plain_conv_w(params["layer2a"]["down_w"])

  # fc: pad the class dim to a full 128-lane slab (lane-dense store); the
  # real logits are sliced out below.
  ncp = ((num_classes + 127) // 128) * 128
  fc_w = jnp.zeros((c_fc, ncp), jnp.float32).at[:, :num_classes].set(
      jnp.transpose(params["fc_w"])).astype(jnp.bfloat16)
  fc_b = jnp.zeros((1, ncp), jnp.float32).at[0, :num_classes].set(
      params["fc_b"])

  inputs = (x_pad, stem_w, stem_b, *a_w, *b_w, d_w, *c_w, *e_w, fc_w, fc_b)

  def _const_spec(arr):
    nd = arr.ndim
    return pl.BlockSpec(arr.shape, lambda n, _nd=nd: (0,) * _nd)

  in_specs = [pl.BlockSpec((1, L + 4, c_in), lambda n: (n, 0, 0))]
  in_specs += [_const_spec(a) for a in inputs[1:]]

  out = pl.pallas_call(
      _make_fused_kernel(L1, L2, L3),
      out_shape=jax.ShapeDtypeStruct((N, 1, ncp), jnp.float32),
      grid=(N,),
      in_specs=in_specs,
      out_specs=pl.BlockSpec((1, 1, ncp), lambda n: (n, 0, 0)),
      scratch_shapes=[
          pltpu.VMEM((L + 4, c_in), jnp.float32),   # staged stem input
          pltpu.VMEM((L1 + 2, 64), jnp.float32),    # stem out (padded for pool)
          pltpu.VMEM((L2 + 2, 64), jnp.float32),    # maxpool out
          pltpu.VMEM((L2 + 2, 64), jnp.float32),    # block temp (64 ch)
          pltpu.VMEM((L2 + 2, 64), jnp.float32),    # layer1a out
          pltpu.VMEM((L2 + 2, 64), jnp.float32),    # layer1b out
          pltpu.VMEM((L3 + 2, 128), jnp.float32),   # block temp (128 ch)
          pltpu.VMEM((L3 + 2, 128), jnp.float32),   # layer2a out
      ],
      compiler_params=pltpu.CompilerParams(
          dimension_semantics=("parallel",)),
  )(*inputs)

  return out[:, 0, :num_classes]


# ---------------------------------------------------------------------------
# Deterministic parameter construction (same structure as the PyTorch module)
# ---------------------------------------------------------------------------

def _conv_w(key, c_out, c_in, k):
  return 0.1 * jax.random.normal(key, (c_out, c_in, k), jnp.float32)


def _bn_params(key, c, prefix):
  k1, k2, k3, k4 = jax.random.split(key, 4)
  return {
      prefix + "_gamma": jax.random.uniform(k1, (c,), jnp.float32, 0.8, 1.2),
      prefix + "_beta": 0.1 * jax.random.normal(k2, (c,), jnp.float32),
      prefix + "_mean": 0.1 * jax.random.normal(k3, (c,), jnp.float32),
      prefix + "_var": jax.random.uniform(k4, (c,), jnp.float32, 0.5, 1.5),
  }


def _block_params(key, c_in, c_out, downsample):
  ks = jax.random.split(key, 5)
  p = {"conv1_w": _conv_w(ks[0], c_out, c_in, 3),
       "conv2_w": _conv_w(ks[1], c_out, c_out, 3)}
  p.update(_bn_params(ks[2], c_out, "bn1"))
  p.update(_bn_params(ks[3], c_out, "bn2"))
  if downsample:
    p["down_w"] = _conv_w(ks[4], c_out, c_in, 1)
  return p


def make_params(key, num_channel, num_classes):
  ks = jax.random.split(key, 8)
  params = {"conv1_w": _conv_w(ks[0], 64, num_channel, 5)}
  params.update(_bn_params(ks[1], 64, "bn1"))
  params["layer1a"] = _block_params(ks[2], 64, 64, downsample=False)
  params["layer1b"] = _block_params(ks[3], 64, 64, downsample=False)
  params["layer2a"] = _block_params(ks[4], 64, 128, downsample=True)
  params["layer2b"] = _block_params(ks[5], 128, 128, downsample=False)
  params["fc_w"] = 0.1 * jax.random.normal(ks[6], (num_classes, 128),
                                           jnp.float32)
  params["fc_b"] = 0.1 * jax.random.normal(ks[7], (num_classes,), jnp.float32)
  return params


# ---------------------------------------------------------------------------

if __name__ == "__main__":
  N, num_channel, L, num_classes = 2, 4, 32, 6
  key = jax.random.PRNGKey(0)
  k_x, k_p = jax.random.split(key)

  x = jax.random.normal(k_x, (N, num_channel, L), jnp.float32)   # NCL (PyTorch)
  params = make_params(k_p, num_channel, num_classes)

  out = resnet1d_small_forward(x, params)
  out = jax.block_until_ready(out)
  assert out.shape == (N, num_classes), out.shape
  assert jnp.all(jnp.isfinite(out))
  print("KERNEL_OK")
</pallas_src>

<mosaic_0001>
module attributes {stable_mosaic.version = 11 : i64} {
  func.func @kernel(%arg0: i32, %arg1: memref<1x36x4xf32, #tpu.memory_space<vmem>>, %arg2: memref<20x64xbf16, #tpu.memory_space<vmem>>, %arg3: memref<1x64xf32, #tpu.memory_space<vmem>>, %arg4: memref<192x64xbf16, #tpu.memory_space<vmem>>, %arg5: memref<1x64xf32, #tpu.memory_space<vmem>>, %arg6: memref<192x64xbf16, #tpu.memory_space<vmem>>, %arg7: memref<1x64xf32, #tpu.memory_space<vmem>>, %arg8: memref<192x64xbf16, #tpu.memory_space<vmem>>, %arg9: memref<1x64xf32, #tpu.memory_space<vmem>>, %arg10: memref<192x64xbf16, #tpu.memory_space<vmem>>, %arg11: memref<1x64xf32, #tpu.memory_space<vmem>>, %arg12: memref<64x128xbf16, #tpu.memory_space<vmem>>, %arg13: memref<192x128xbf16, #tpu.memory_space<vmem>>, %arg14: memref<1x128xf32, #tpu.memory_space<vmem>>, %arg15: memref<384x128xbf16, #tpu.memory_space<vmem>>, %arg16: memref<1x128xf32, #tpu.memory_space<vmem>>, %arg17: memref<384x128xbf16, #tpu.memory_space<vmem>>, %arg18: memref<1x128xf32, #tpu.memory_space<vmem>>, %arg19: memref<384x128xbf16, #tpu.memory_space<vmem>>, %arg20: memref<1x128xf32, #tpu.memory_space<vmem>>, %arg21: memref<128x128xbf16, #tpu.memory_space<vmem>>, %arg22: memref<1x128xf32, #tpu.memory_space<vmem>>, %arg23: memref<1x1x128xf32, #tpu.memory_space<vmem>>, %arg24: memref<36x4xf32, #tpu.memory_space<vmem>>, %arg25: memref<18x64xf32, #tpu.memory_space<vmem>>, %arg26: memref<10x64xf32, #tpu.memory_space<vmem>>, %arg27: memref<10x64xf32, #tpu.memory_space<vmem>>, %arg28: memref<10x64xf32, #tpu.memory_space<vmem>>, %arg29: memref<10x64xf32, #tpu.memory_space<vmem>>, %arg30: memref<6x128xf32, #tpu.memory_space<vmem>>, %arg31: memref<6x128xf32, #tpu.memory_space<vmem>>) attributes {dimension_semantics = [#tpu.dimension_semantics<parallel>], iteration_bounds = array<i64: 2>, scalar_prefetch = 0 : i64, scratch_operands = 8 : i64, tpu.core_type = #tpu.core_type<tc>, window_params = [{transform_indices = @transform_0, window_bounds = array<i64: 1, 36, 4>}, {pipeline_mode = #tpu.pipeline_mode<synchronous>, transform_indices = @transform_1, window_bounds = array<i64: 20, 64>}, {pipeline_mode = #tpu.pipeline_mode<synchronous>, transform_indices = @transform_2, window_bounds = array<i64: 1, 64>}, {pipeline_mode = #tpu.pipeline_mode<synchronous>, transform_indices = @transform_3, window_bounds = array<i64: 192, 64>}, {pipeline_mode = #tpu.pipeline_mode<synchronous>, transform_indices = @transform_4, window_bounds = array<i64: 1, 64>}, {pipeline_mode = #tpu.pipeline_mode<synchronous>, transform_indices = @transform_5, window_bounds = array<i64: 192, 64>}, {pipeline_mode = #tpu.pipeline_mode<synchronous>, transform_indices = @transform_6, window_bounds = array<i64: 1, 64>}, {pipeline_mode = #tpu.pipeline_mode<synchronous>, transform_indices = @transform_7, window_bounds = array<i64: 192, 64>}, {pipeline_mode = #tpu.pipeline_mode<synchronous>, transform_indices = @transform_8, window_bounds = array<i64: 1, 64>}, {pipeline_mode = #tpu.pipeline_mode<synchronous>, transform_indices = @transform_9, window_bounds = array<i64: 192, 64>}, {pipeline_mode = #tpu.pipeline_mode<synchronous>, transform_indices = @transform_10, window_bounds = array<i64: 1, 64>}, {pipeline_mode = #tpu.pipeline_mode<synchronous>, transform_indices = @transform_11, window_bounds = array<i64: 64, 128>}, {pipeline_mode = #tpu.pipeline_mode<synchronous>, transform_indices = @transform_12, window_bounds = array<i64: 192, 128>}, {pipeline_mode = #tpu.pipeline_mode<synchronous>, transform_indices = @transform_13, window_bounds = array<i64: 1, 128>}, {pipeline_mode = #tpu.pipeline_mode<synchronous>, transform_indices = @transform_14, window_bounds = array<i64: 384, 128>}, {pipeline_mode = #tpu.pipeline_mode<synchronous>, transform_indices = @transform_15, window_bounds = array<i64: 1, 128>}, {pipeline_mode = #tpu.pipeline_mode<synchronous>, transform_indices = @transform_16, window_bounds = array<i64: 384, 128>}, {pipeline_mode = #tpu.pipeline_mode<synchronous>, transform_indices = @transform_17, window_bounds = array<i64: 1, 128>}, {pipeline_mode = #tpu.pipeline_mode<synchronous>, transform_indices = @transform_18, window_bounds = array<i64: 384, 128>}, {pipeline_mode = #tpu.pipeline_mode<synchronous>, transform_indices = @transform_19, window_bounds = array<i64: 1, 128>}, {pipeline_mode = #tpu.pipeline_mode<synchronous>, transform_indices = @transform_20, window_bounds = array<i64: 128, 128>}, {pipeline_mode = #tpu.pipeline_mode<synchronous>, transform_indices = @transform_21, window_bounds = array<i64: 1, 128>}, {transform_indices = @transform_22, window_bounds = array<i64: 1, 1, 128>}]} {
    %cst = arith.constant 0.000000e+00 : f32
    %0 = vector.broadcast %cst : f32 to vector<1x64xf32>
    %c0 = arith.constant 0 : index
    %c0_0 = arith.constant 0 : index
    %1 = vector.load %arg25[%c0, %c0_0] : memref<18x64xf32, #tpu.memory_space<vmem>>, vector<1x64xf32>
    tpu.vector_store %arg25[%c0, %c0_0], %0 {strides = array<i32>} : memref<18x64xf32, #tpu.memory_space<vmem>>, vector<1x64xf32>,
    %c17 = arith.constant 17 : index
    %c0_1 = arith.constant 0 : index
    %2 = vector.load %arg25[%c17, %c0_1] : memref<18x64xf32, #tpu.memory_space<vmem>>, vector<1x64xf32>
    tpu.vector_store %arg25[%c17, %c0_1], %0 {strides = array<i32>} : memref<18x64xf32, #tpu.memory_space<vmem>>, vector<1x64xf32>,
    %cst_2 = arith.constant 0.000000e+00 : f32
    %3 = vector.broadcast %cst_2 : f32 to vector<1x64xf32>
    %c0_3 = arith.constant 0 : index
    %c0_4 = arith.constant 0 : index
    %4 = vector.load %arg26[%c0_3, %c0_4] : memref<10x64xf32, #tpu.memory_space<vmem>>, vector<1x64xf32>
    tpu.vector_store %arg26[%c0_3, %c0_4], %3 {strides = array<i32>} : memref<10x64xf32, #tpu.memory_space<vmem>>, vector<1x64xf32>,
    %c9 = arith.constant 9 : index
    %c0_5 = arith.constant 0 : index
    %5 = vector.load %arg26[%c9, %c0_5] : memref<10x64xf32, #tpu.memory_space<vmem>>, vector<1x64xf32>
    tpu.vector_store %arg26[%c9, %c0_5], %3 {strides = array<i32>} : memref<10x64xf32, #tpu.memory_space<vmem>>, vector<1x64xf32>,
    %cst_6 = arith.constant 0.000000e+00 : f32
    %6 = vector.broadcast %cst_6 : f32 to vector<1x64xf32>
    %c0_7 = arith.constant 0 : index
    %c0_8 = arith.constant 0 : index
    %7 = vector.load %arg27[%c0_7, %c0_8] : memref<10x64xf32, #tpu.memory_space<vmem>>, vector<1x64xf32>
    tpu.vector_store %arg27[%c0_7, %c0_8], %6 {strides = array<i32>} : memref<10x64xf32, #tpu.memory_space<vmem>>, vector<1x64xf32>,
    %c9_9 = arith.constant 9 : index
    %c0_10 = arith.constant 0 : index
    %8 = vector.load %arg27[%c9_9, %c0_10] : memref<10x64xf32, #tpu.memory_space<vmem>>, vector<1x64xf32>
    tpu.vector_store %arg27[%c9_9, %c0_10], %6 {strides = array<i32>} : memref<10x64xf32, #tpu.memory_space<vmem>>, vector<1x64xf32>,
    %cst_11 = arith.constant 0.000000e+00 : f32
    %9 = vector.broadcast %cst_11 : f32 to vector<1x64xf32>
    %c0_12 = arith.constant 0 : index
    %c0_13 = arith.constant 0 : index
    %10 = vector.load %arg28[%c0_12, %c0_13] : memref<10x64xf32, #tpu.memory_space<vmem>>, vector<1x64xf32>
    tpu.vector_store %arg28[%c0_12, %c0_13], %9 {strides = array<i32>} : memref<10x64xf32, #tpu.memory_space<vmem>>, vector<1x64xf32>,
    %c9_14 = arith.constant 9 : index
    %c0_15 = arith.constant 0 : index
    %11 = vector.load %arg28[%c9_14, %c0_15] : memref<10x64xf32, #tpu.memory_space<vmem>>, vector<1x64xf32>
    tpu.vector_store %arg28[%c9_14, %c0_15], %9 {strides = array<i32>} : memref<10x64xf32, #tpu.memory_space<vmem>>, vector<1x64xf32>,
    %cst_16 = arith.constant 0.000000e+00 : f32
    %12 = vector.broadcast %cst_16 : f32 to vector<1x64xf32>
    %c0_17 = arith.constant 0 : index
    %c0_18 = arith.constant 0 : index
    %13 = vector.load %arg29[%c0_17, %c0_18] : memref<10x64xf32, #tpu.memory_space<vmem>>, vector<1x64xf32>
    tpu.vector_store %arg29[%c0_17, %c0_18], %12 {strides = array<i32>} : memref<10x64xf32, #tpu.memory_space<vmem>>, vector<1x64xf32>,
    %c9_19 = arith.constant 9 : index
    %c0_20 = arith.constant 0 : index
    %14 = vector.load %arg29[%c9_19, %c0_20] : memref<10x64xf32, #tpu.memory_space<vmem>>, vector<1x64xf32>
    tpu.vector_store %arg29[%c9_19, %c0_20], %12 {strides = array<i32>} : memref<10x64xf32, #tpu.memory_space<vmem>>, vector<1x64xf32>,
    %cst_21 = arith.constant 0.000000e+00 : f32
    %15 = vector.broadcast %cst_21 : f32 to vector<1x128xf32>
    %c0_22 = arith.constant 0 : index
    %c0_23 = arith.constant 0 : index
    %16 = vector.load %arg30[%c0_22, %c0_23] : memref<6x128xf32, #tpu.memory_space<vmem>>, vector<1x128xf32>
    tpu.vector_store %arg30[%c0_22, %c0_23], %15 {strides = array<i32>} : memref<6x128xf32, #tpu.memory_space<vmem>>, vector<1x128xf32>,
    %c5 = arith.constant 5 : index
    %c0_24 = arith.constant 0 : index
    %17 = vector.load %arg30[%c5, %c0_24] : memref<6x128xf32, #tpu.memory_space<vmem>>, vector<1x128xf32>
    tpu.vector_store %arg30[%c5, %c0_24], %15 {strides = array<i32>} : memref<6x128xf32, #tpu.memory_space<vmem>>, vector<1x128xf32>,
    %cst_25 = arith.constant 0.000000e+00 : f32
    %18 = vector.broadcast %cst_25 : f32 to vector<1x128xf32>
    %c0_26 = arith.constant 0 : index
    %c0_27 = arith.constant 0 : index
    %19 = vector.load %arg31[%c0_26, %c0_27] : memref<6x128xf32, #tpu.memory_space<vmem>>, vector<1x128xf32>
    tpu.vector_store %arg31[%c0_26, %c0_27], %18 {strides = array<i32>} : memref<6x128xf32, #tpu.memory_space<vmem>>, vector<1x128xf32>,
    %c5_28 = arith.constant 5 : index
    %c0_29 = arith.constant 0 : index
    %20 = vector.load %arg31[%c5_28, %c0_29] : memref<6x128xf32, #tpu.memory_space<vmem>>, vector<1x128xf32>
    tpu.vector_store %arg31[%c5_28, %c0_29], %18 {strides = array<i32>} : memref<6x128xf32, #tpu.memory_space<vmem>>, vector<1x128xf32>,
    %c0_30 = arith.constant 0 : index
    %c0_31 = arith.constant 0 : index
    %c0_32 = arith.constant 0 : index
    %21 = vector.load %arg1[%c0_30, %c0_31, %c0_32] : memref<1x36x4xf32, #tpu.memory_space<vmem>>, vector<1x36x4xf32>
    %22 = vector.shape_cast %21 : vector<1x36x4xf32> to vector<36x4xf32>
    %c0_33 = arith.constant 0 : index
    %c0_34 = arith.constant 0 : index
    %23 = vector.load %arg24[%c0_33, %c0_34] : memref<36x4xf32, #tpu.memory_space<vmem>>, vector<36x4xf32>
    tpu.vector_store %arg24[%c0_33, %c0_34], %22 {strides = array<i32>} : memref<36x4xf32, #tpu.memory_space<vmem>>, vector<36x4xf32>,
    %c0_35 = arith.constant 0 : index
    %c0_36 = arith.constant 0 : index
    %24 = tpu.strided_load %arg24[%c0_35, %c0_36] {strides = array<i32: 2, 1>} : memref<36x4xf32, #tpu.memory_space<vmem>>, vector<16x4xf32>
    %c1 = arith.constant 1 : index
    %c0_37 = arith.constant 0 : index
    %25 = tpu.strided_load %arg24[%c1, %c0_37] {strides = array<i32: 2, 1>} : memref<36x4xf32, #tpu.memory_space<vmem>>, vector<16x4xf32>
    %c2 = arith.constant 2 : index
    %c0_38 = arith.constant 0 : index
    %26 = tpu.strided_load %arg24[%c2, %c0_38] {strides = array<i32: 2, 1>} : memref<36x4xf32, #tpu.memory_space<vmem>>, vector<16x4xf32>
    %c3 = arith.constant 3 : index
    %c0_39 = arith.constant 0 : index
    %27 = tpu.strided_load %arg24[%c3, %c0_39] {strides = array<i32: 2, 1>} : memref<36x4xf32, #tpu.memory_space<vmem>>, vector<16x4xf32>
    %c4 = arith.constant 4 : index
    %c0_40 = arith.constant 0 : index
    %28 = tpu.strided_load %arg24[%c4, %c0_40] {strides = array<i32: 2, 1>} : memref<36x4xf32, #tpu.memory_space<vmem>>, vector<16x4xf32>
    %29 = tpu.concatenate %24, %25, %26, %27, %28 in 1 : vector<16x4xf32>, vector<16x4xf32>, vector<16x4xf32>, vector<16x4xf32>, vector<16x4xf32> -> vector<16x20xf32>
    %30 = arith.truncf %29 : vector<16x20xf32> to vector<16x20xbf16>
    %c0_41 = arith.constant 0 : index
    %c0_42 = arith.constant 0 : index
    %31 = vector.load %arg2[%c0_41, %c0_42] : memref<20x64xbf16, #tpu.memory_space<vmem>>, vector<20x64xbf16>
    %cst_43 = arith.constant dense<0.000000e+00> : vector<16x64xf32>
    %32 = tpu.matmul %30, %31, %cst_43 {dimension_numbers = #tpu.dot_dimension_numbers<[1], [0], [0], [1], [0, 0, 1, 1], [], []>} : vector<16x20xbf16>, vector<20x64xbf16>, vector<16x64xf32> -> vector<16x64xf32>
    %c0_44 = arith.constant 0 : index
    %c0_45 = arith.constant 0 : index
    %33 = vector.load %arg3[%c0_44, %c0_45] : memref<1x64xf32, #tpu.memory_space<vmem>>, vector<1x64xf32>
    %34 = vector.broadcast %33 : vector<1x64xf32> to vector<16x64xf32>
    %35 = arith.addf %32, %34 : vector<16x64xf32>
    %cst_46 = arith.constant 0.000000e+00 : f32
    %36 = vector.broadcast %cst_46 : f32 to vector<16x64xf32>
    %37 = arith.maximumf %35, %36 : vector<16x64xf32>
    %c1_47 = arith.constant 1 : index
    %c0_48 = arith.constant 0 : index
    %38 = vector.load %arg25[%c1_47, %c0_48] : memref<18x64xf32, #tpu.memory_space<vmem>>, vector<16x64xf32>
    tpu.vector_store %arg25[%c1_47, %c0_48], %37 {strides = array<i32>} : memref<18x64xf32, #tpu.memory_space<vmem>>, vector<16x64xf32>,
    %c0_49 = arith.constant 0 : index
    %c0_50 = arith.constant 0 : index
    %39 = tpu.strided_load %arg25[%c0_49, %c0_50] {strides = array<i32: 2, 1>} : memref<18x64xf32, #tpu.memory_space<vmem>>, vector<8x64xf32>
    %c1_51 = arith.constant 1 : index
    %c0_52 = arith.constant 0 : index
    %40 = tpu.strided_load %arg25[%c1_51, %c0_52] {strides = array<i32: 2, 1>} : memref<18x64xf32, #tpu.memory_space<vmem>>, vector<8x64xf32>
    %c2_53 = arith.constant 2 : index
    %c0_54 = arith.constant 0 : index
    %41 = tpu.strided_load %arg25[%c2_53, %c0_54] {strides = array<i32: 2, 1>} : memref<18x64xf32, #tpu.memory_space<vmem>>, vector<8x64xf32>
    %42 = arith.maximumf %39, %40 : vector<8x64xf32>
    %43 = arith.maximumf %42, %41 : vector<8x64xf32>
    %c1_55 = arith.constant 1 : index
    %c0_56 = arith.constant 0 : index
    %44 = vector.load %arg26[%c1_55, %c0_56] : memref<10x64xf32, #tpu.memory_space<vmem>>, vector<8x64xf32>
    tpu.vector_store %arg26[%c1_55, %c0_56], %43 {strides = array<i32>} : memref<10x64xf32, #tpu.memory_space<vmem>>, vector<8x64xf32>,
    %c0_57 = arith.constant 0 : index
    %c0_58 = arith.constant 0 : index
    %45 = vector.load %arg26[%c0_57, %c0_58] : memref<10x64xf32, #tpu.memory_space<vmem>>, vector<8x64xf32>
    %c1_59 = arith.constant 1 : index
    %c0_60 = arith.constant 0 : index
    %46 = vector.load %arg26[%c1_59, %c0_60] : memref<10x64xf32, #tpu.memory_space<vmem>>, vector<8x64xf32>
    %c2_61 = arith.constant 2 : index
    %c0_62 = arith.constant 0 : index
    %47 = vector.load %arg26[%c2_61, %c0_62] : memref<10x64xf32, #tpu.memory_space<vmem>>, vector<8x64xf32>
    %48 = tpu.concatenate %45, %46, %47 in 1 : vector<8x64xf32>, vector<8x64xf32>, vector<8x64xf32> -> vector<8x192xf32>
    %49 = arith.truncf %48 : vector<8x192xf32> to vector<8x192xbf16>
    %c0_63 = arith.constant 0 : index
    %c0_64 = arith.constant 0 : index
    %50 = vector.load %arg4[%c0_63, %c0_64] : memref<192x64xbf16, #tpu.memory_space<vmem>>, vector<192x64xbf16>
    %cst_65 = arith.constant dense<0.000000e+00> : vector<8x64xf32>
    %51 = tpu.matmul %49, %50, %cst_65 {dimension_numbers = #tpu.dot_dimension_numbers<[1], [0], [0], [1], [0, 0, 1, 1], [], []>} : vector<8x192xbf16>, vector<192x64xbf16>, vector<8x64xf32> -> vector<8x64xf32>
    %c0_66 = arith.constant 0 : index
    %c0_67 = arith.constant 0 : index
    %52 = vector.load %arg5[%c0_66, %c0_67] : memref<1x64xf32, #tpu.memory_space<vmem>>, vector<1x64xf32>
    %53 = vector.broadcast %52 : vector<1x64xf32> to vector<8x64xf32>
    %54 = arith.addf %51, %53 : vector<8x64xf32>
    %cst_68 = arith.constant 0.000000e+00 : f32
    %55 = vector.broadcast %cst_68 : f32 to vector<8x64xf32>
    %56 = arith.maximumf %54, %55 : vector<8x64xf32>
    %c1_69 = arith.constant 1 : index
    %c0_70 = arith.constant 0 : index
    %57 = vector.load %arg27[%c1_69, %c0_70] : memref<10x64xf32, #tpu.memory_space<vmem>>, vector<8x64xf32>
    tpu.vector_store %arg27[%c1_69, %c0_70], %56 {strides = array<i32>} : memref<10x64xf32, #tpu.memory_space<vmem>>, vector<8x64xf32>,
    %c1_71 = arith.constant 1 : index
    %c0_72 = arith.constant 0 : index
    %58 = vector.load %arg26[%c1_71, %c0_72] : memref<10x64xf32, #tpu.memory_space<vmem>>, vector<8x64xf32>
    %c0_73 = arith.constant 0 : index
    %c0_74 = arith.constant 0 : index
    %59 = vector.load %arg27[%c0_73, %c0_74] : memref<10x64xf32, #tpu.memory_space<vmem>>, vector<8x64xf32>
    %c1_75 = arith.constant 1 : index
    %c0_76 = arith.constant 0 : index
    %60 = vector.load %arg27[%c1_75, %c0_76] : memref<10x64xf32, #tpu.memory_space<vmem>>, vector<8x64xf32>
    %c2_77 = arith.constant 2 : index
    %c0_78 = arith.constant 0 : index
    %61 = vector.load %arg27[%c2_77, %c0_78] : memref<10x64xf32, #tpu.memory_space<vmem>>, vector<8x64xf32>
    %62 = tpu.concatenate %59, %60, %61 in 1 : vector<8x64xf32>, vector<8x64xf32>, vector<8x64xf32> -> vector<8x192xf32>
    %63 = arith.truncf %62 : vector<8x192xf32> to vector<8x192xbf16>
    %c0_79 = arith.constant 0 : index
    %c0_80 = arith.constant 0 : index
    %64 = vector.load %arg6[%c0_79, %c0_80] : memref<192x64xbf16, #tpu.memory_space<vmem>>, vector<192x64xbf16>
    %cst_81 = arith.constant dense<0.000000e+00> : vector<8x64xf32>
    %65 = tpu.matmul %63, %64, %cst_81 {dimension_numbers = #tpu.dot_dimension_numbers<[1], [0], [0], [1], [0, 0, 1, 1], [], []>} : vector<8x192xbf16>, vector<192x64xbf16>, vector<8x64xf32> -> vector<8x64xf32>
    %c0_82 = arith.constant 0 : index
    %c0_83 = arith.constant 0 : index
    %66 = vector.load %arg7[%c0_82, %c0_83] : memref<1x64xf32, #tpu.memory_space<vmem>>, vector<1x64xf32>
    %67 = vector.broadcast %66 : vector<1x64xf32> to vector<8x64xf32>
    %68 = arith.addf %65, %67 : vector<8x64xf32>
    %69 = arith.addf %68, %58 : vector<8x64xf32>
    %cst_84 = arith.constant 0.000000e+00 : f32
    %70 = vector.broadcast %cst_84 : f32 to vector<8x64xf32>
    %71 = arith.maximumf %69, %70 : vector<8x64xf32>
    %c1_85 = arith.constant 1 : index
    %c0_86 = arith.constant 0 : index
    %72 = vector.load %arg28[%c1_85, %c0_86] : memref<10x64xf32, #tpu.memory_space<vmem>>, vector<8x64xf32>
    tpu.vector_store %arg28[%c1_85, %c0_86], %71 {strides = array<i32>} : memref<10x64xf32, #tpu.memory_space<vmem>>, vector<8x64xf32>,
    %c0_87 = arith.constant 0 : index
    %c0_88 = arith.constant 0 : index
    %73 = vector.load %arg28[%c0_87, %c0_88] : memref<10x64xf32, #tpu.memory_space<vmem>>, vector<8x64xf32>
    %c1_89 = arith.constant 1 : index
    %c0_90 = arith.constant 0 : index
    %74 = vector.load %arg28[%c1_89, %c0_90] : memref<10x64xf32, #tpu.memory_space<vmem>>, vector<8x64xf32>
    %c2_91 = arith.constant 2 : index
    %c0_92 = arith.constant 0 : index
    %75 = vector.load %arg28[%c2_91, %c0_92] : memref<10x64xf32, #tpu.memory_space<vmem>>, vector<8x64xf32>
    %76 = tpu.concatenate %73, %74, %75 in 1 : vector<8x64xf32>, vector<8x64xf32>, vector<8x64xf32> -> vector<8x192xf32>
    %77 = arith.truncf %76 : vector<8x192xf32> to vector<8x192xbf16>
    %c0_93 = arith.constant 0 : index
    %c0_94 = arith.constant 0 : index
    %78 = vector.load %arg8[%c0_93, %c0_94] : memref<192x64xbf16, #tpu.memory_space<vmem>>, vector<192x64xbf16>
    %cst_95 = arith.constant dense<0.000000e+00> : vector<8x64xf32>
    %79 = tpu.matmul %77, %78, %cst_95 {dimension_numbers = #tpu.dot_dimension_numbers<[1], [0], [0], [1], [0, 0, 1, 1], [], []>} : vector<8x192xbf16>, vector<192x64xbf16>, vector<8x64xf32> -> vector<8x64xf32>
    %c0_96 = arith.constant 0 : index
    %c0_97 = arith.constant 0 : index
    %80 = vector.load %arg9[%c0_96, %c0_97] : memref<1x64xf32, #tpu.memory_space<vmem>>, vector<1x64xf32>
    %81 = vector.broadcast %80 : vector<1x64xf32> to vector<8x64xf32>
    %82 = arith.addf %79, %81 : vector<8x64xf32>
    %cst_98 = arith.constant 0.000000e+00 : f32
    %83 = vector.broadcast %cst_98 : f32 to vector<8x64xf32>
    %84 = arith.maximumf %82, %83 : vector<8x64xf32>
    %c1_99 = arith.constant 1 : index
    %c0_100 = arith.constant 0 : index
    %85 = vector.load %arg27[%c1_99, %c0_100] : memref<10x64xf32, #tpu.memory_space<vmem>>, vector<8x64xf32>
    tpu.vector_store %arg27[%c1_99, %c0_100], %84 {strides = array<i32>} : memref<10x64xf32, #tpu.memory_space<vmem>>, vector<8x64xf32>,
    %c1_101 = arith.constant 1 : index
    %c0_102 = arith.constant 0 : index
    %86 = vector.load %arg28[%c1_101, %c0_102] : memref<10x64xf32, #tpu.memory_space<vmem>>, vector<8x64xf32>
    %c0_103 = arith.constant 0 : index
    %c0_104 = arith.constant 0 : index
    %87 = vector.load %arg27[%c0_103, %c0_104] : memref<10x64xf32, #tpu.memory_space<vmem>>, vector<8x64xf32>
    %c1_105 = arith.constant 1 : index
    %c0_106 = arith.constant 0 : index
    %88 = vector.load %arg27[%c1_105, %c0_106] : memref<10x64xf32, #tpu.memory_space<vmem>>, vector<8x64xf32>
    %c2_107 = arith.constant 2 : index
    %c0_108 = arith.constant 0 : index
    %89 = vector.load %arg27[%c2_107, %c0_108] : memref<10x64xf32, #tpu.memory_space<vmem>>, vector<8x64xf32>
    %90 = tpu.concatenate %87, %88, %89 in 1 : vector<8x64xf32>, vector<8x64xf32>, vector<8x64xf32> -> vector<8x192xf32>
    %91 = arith.truncf %90 : vector<8x192xf32> to vector<8x192xbf16>
    %c0_109 = arith.constant 0 : index
    %c0_110 = arith.constant 0 : index
    %92 = vector.load %arg10[%c0_109, %c0_110] : memref<192x64xbf16, #tpu.memory_space<vmem>>, vector<192x64xbf16>
    %cst_111 = arith.constant dense<0.000000e+00> : vector<8x64xf32>
    %93 = tpu.matmul %91, %92, %cst_111 {dimension_numbers = #tpu.dot_dimension_numbers<[1], [0], [0], [1], [0, 0, 1, 1], [], []>} : vector<8x192xbf16>, vector<192x64xbf16>, vector<8x64xf32> -> vector<8x64xf32>
    %c0_112 = arith.constant 0 : index
    %c0_113 = arith.constant 0 : index
    %94 = vector.load %arg11[%c0_112, %c0_113] : memref<1x64xf32, #tpu.memory_space<vmem>>, vector<1x64xf32>
    %95 = vector.broadcast %94 : vector<1x64xf32> to vector<8x64xf32>
    %96 = arith.addf %93, %95 : vector<8x64xf32>
    %97 = arith.addf %96, %86 : vector<8x64xf32>
    %cst_114 = arith.constant 0.000000e+00 : f32
    %98 = vector.broadcast %cst_114 : f32 to vector<8x64xf32>
    %99 = arith.maximumf %97, %98 : vector<8x64xf32>
    %c1_115 = arith.constant 1 : index
    %c0_116 = arith.constant 0 : index
    %100 = vector.load %arg29[%c1_115, %c0_116] : memref<10x64xf32, #tpu.memory_space<vmem>>, vector<8x64xf32>
    tpu.vector_store %arg29[%c1_115, %c0_116], %99 {strides = array<i32>} : memref<10x64xf32, #tpu.memory_space<vmem>>, vector<8x64xf32>,
    %c1_117 = arith.constant 1 : index
    %c0_118 = arith.constant 0 : index
    %101 = tpu.strided_load %arg29[%c1_117, %c0_118] {strides = array<i32: 2, 1>} : memref<10x64xf32, #tpu.memory_space<vmem>>, vector<4x64xf32>
    %102 = arith.truncf %101 : vector<4x64xf32> to vector<4x64xbf16>
    %c0_119 = arith.constant 0 : index
    %c0_120 = arith.constant 0 : index
    %103 = vector.load %arg12[%c0_119, %c0_120] : memref<64x128xbf16, #tpu.memory_space<vmem>>, vector<64x128xbf16>
    %cst_121 = arith.constant dense<0.000000e+00> : vector<4x128xf32>
    %104 = tpu.matmul %102, %103, %cst_121 {dimension_numbers = #tpu.dot_dimension_numbers<[1], [0], [0], [1], [0, 0, 1, 1], [], []>} : vector<4x64xbf16>, vector<64x128xbf16>, vector<4x128xf32> -> vector<4x128xf32>
    %c0_122 = arith.constant 0 : index
    %c0_123 = arith.constant 0 : index
    %105 = tpu.strided_load %arg29[%c0_122, %c0_123] {strides = array<i32: 2, 1>} : memref<10x64xf32, #tpu.memory_space<vmem>>, vector<4x64xf32>
    %c1_124 = arith.constant 1 : index
    %c0_125 = arith.constant 0 : index
    %106 = tpu.strided_load %arg29[%c1_124, %c0_125] {strides = array<i32: 2, 1>} : memref<10x64xf32, #tpu.memory_space<vmem>>, vector<4x64xf32>
    %c2_126 = arith.constant 2 : index
    %c0_127 = arith.constant 0 : index
    %107 = tpu.strided_load %arg29[%c2_126, %c0_127] {strides = array<i32: 2, 1>} : memref<10x64xf32, #tpu.memory_space<vmem>>, vector<4x64xf32>
    %108 = tpu.concatenate %105, %106, %107 in 1 : vector<4x64xf32>, vector<4x64xf32>, vector<4x64xf32> -> vector<4x192xf32>
    %109 = arith.truncf %108 : vector<4x192xf32> to vector<4x192xbf16>
    %c0_128 = arith.constant 0 : index
    %c0_129 = arith.constant 0 : index
    %110 = vector.load %arg13[%c0_128, %c0_129] : memref<192x128xbf16, #tpu.memory_space<vmem>>, vector<192x128xbf16>
    %cst_130 = arith.constant dense<0.000000e+00> : vector<4x128xf32>
    %111 = tpu.matmul %109, %110, %cst_130 {dimension_numbers = #tpu.dot_dimension_numbers<[1], [0], [0], [1], [0, 0, 1, 1], [], []>} : vector<4x192xbf16>, vector<192x128xbf16>, vector<4x128xf32> -> vector<4x128xf32>
    %c0_131 = arith.constant 0 : index
    %c0_132 = arith.constant 0 : index
    %112 = vector.load %arg14[%c0_131, %c0_132] : memref<1x128xf32, #tpu.memory_space<vmem>>, vector<1x128xf32>
    %113 = vector.broadcast %112 : vector<1x128xf32> to vector<4x128xf32>
    %114 = arith.addf %111, %113 : vector<4x128xf32>
    %cst_133 = arith.constant 0.000000e+00 : f32
    %115 = vector.broadcast %cst_133 : f32 to vector<4x128xf32>
    %116 = arith.maximumf %114, %115 : vector<4x128xf32>
    %c1_134 = arith.constant 1 : index
    %c0_135 = arith.constant 0 : index
    %117 = vector.load %arg30[%c1_134, %c0_135] : memref<6x128xf32, #tpu.memory_space<vmem>>, vector<4x128xf32>
    tpu.vector_store %arg30[%c1_134, %c0_135], %116 {strides = array<i32>} : memref<6x128xf32, #tpu.memory_space<vmem>>, vector<4x128xf32>,
    %c0_136 = arith.constant 0 : index
    %c0_137 = arith.constant 0 : index
    %118 = vector.load %arg30[%c0_136, %c0_137] : memref<6x128xf32, #tpu.memory_space<vmem>>, vector<4x128xf32>
    %c1_138 = arith.constant 1 : index
    %c0_139 = arith.constant 0 : index
    %119 = vector.load %arg30[%c1_138, %c0_139] : memref<6x128xf32, #tpu.memory_space<vmem>>, vector<4x128xf32>
    %c2_140 = arith.constant 2 : index
    %c0_141 = arith.constant 0 : index
    %120 = vector.load %arg30[%c2_140, %c0_141] : memref<6x128xf32, #tpu.memory_space<vmem>>, vector<4x128xf32>
    %121 = tpu.concatenate %118, %119, %120 in 1 : vector<4x128xf32>, vector<4x128xf32>, vector<4x128xf32> -> vector<4x384xf32>
    %122 = arith.truncf %121 : vector<4x384xf32> to vector<4x384xbf16>
    %c0_142 = arith.constant 0 : index
    %c0_143 = arith.constant 0 : index
    %123 = vector.load %arg15[%c0_142, %c0_143] : memref<384x128xbf16, #tpu.memory_space<vmem>>, vector<384x128xbf16>
    %cst_144 = arith.constant dense<0.000000e+00> : vector<4x128xf32>
    %124 = tpu.matmul %122, %123, %cst_144 {dimension_numbers = #tpu.dot_dimension_numbers<[1], [0], [0], [1], [0, 0, 1, 1], [], []>} : vector<4x384xbf16>, vector<384x128xbf16>, vector<4x128xf32> -> vector<4x128xf32>
    %c0_145 = arith.constant 0 : index
    %c0_146 = arith.constant 0 : index
    %125 = vector.load %arg16[%c0_145, %c0_146] : memref<1x128xf32, #tpu.memory_space<vmem>>, vector<1x128xf32>
    %126 = vector.broadcast %125 : vector<1x128xf32> to vector<4x128xf32>
    %127 = arith.addf %124, %126 : vector<4x128xf32>
    %128 = arith.addf %127, %104 : vector<4x128xf32>
    %cst_147 = arith.constant 0.000000e+00 : f32
    %129 = vector.broadcast %cst_147 : f32 to vector<4x128xf32>
    %130 = arith.maximumf %128, %129 : vector<4x128xf32>
    %c1_148 = arith.constant 1 : index
    %c0_149 = arith.constant 0 : index
    %131 = vector.load %arg31[%c1_148, %c0_149] : memref<6x128xf32, #tpu.memory_space<vmem>>, vector<4x128xf32>
    tpu.vector_store %arg31[%c1_148, %c0_149], %130 {strides = array<i32>} : memref<6x128xf32, #tpu.memory_space<vmem>>, vector<4x128xf32>,
    %c0_150 = arith.constant 0 : index
    %c0_151 = arith.constant 0 : index
    %132 = vector.load %arg31[%c0_150, %c0_151] : memref<6x128xf32, #tpu.memory_space<vmem>>, vector<4x128xf32>
    %c1_152 = arith.constant 1 : index
    %c0_153 = arith.constant 0 : index
    %133 = vector.load %arg31[%c1_152, %c0_153] : memref<6x128xf32, #tpu.memory_space<vmem>>, vector<4x128xf32>
    %c2_154 = arith.constant 2 : index
    %c0_155 = arith.constant 0 : index
    %134 = vector.load %arg31[%c2_154, %c0_155] : memref<6x128xf32, #tpu.memory_space<vmem>>, vector<4x128xf32>
    %135 = tpu.concatenate %132, %133, %134 in 1 : vector<4x128xf32>, vector<4x128xf32>, vector<4x128xf32> -> vector<4x384xf32>
    %136 = arith.truncf %135 : vector<4x384xf32> to vector<4x384xbf16>
    %c0_156 = arith.constant 0 : index
    %c0_157 = arith.constant 0 : index
    %137 = vector.load %arg17[%c0_156, %c0_157] : memref<384x128xbf16, #tpu.memory_space<vmem>>, vector<384x128xbf16>
    %cst_158 = arith.constant dense<0.000000e+00> : vector<4x128xf32>
    %138 = tpu.matmul %136, %137, %cst_158 {dimension_numbers = #tpu.dot_dimension_numbers<[1], [0], [0], [1], [0, 0, 1, 1], [], []>} : vector<4x384xbf16>, vector<384x128xbf16>, vector<4x128xf32> -> vector<4x128xf32>
    %c0_159 = arith.constant 0 : index
    %c0_160 = arith.constant 0 : index
    %139 = vector.load %arg18[%c0_159, %c0_160] : memref<1x128xf32, #tpu.memory_space<vmem>>, vector<1x128xf32>
    %140 = vector.broadcast %139 : vector<1x128xf32> to vector<4x128xf32>
    %141 = arith.addf %138, %140 : vector<4x128xf32>
    %cst_161 = arith.constant 0.000000e+00 : f32
    %142 = vector.broadcast %cst_161 : f32 to vector<4x128xf32>
    %143 = arith.maximumf %141, %142 : vector<4x128xf32>
    %c1_162 = arith.constant 1 : index
    %c0_163 = arith.constant 0 : index
    %144 = vector.load %arg30[%c1_162, %c0_163] : memref<6x128xf32, #tpu.memory_space<vmem>>, vector<4x128xf32>
    tpu.vector_store %arg30[%c1_162, %c0_163], %143 {strides = array<i32>} : memref<6x128xf32, #tpu.memory_space<vmem>>, vector<4x128xf32>,
    %c1_164 = arith.constant 1 : index
    %c0_165 = arith.constant 0 : index
    %145 = vector.load %arg31[%c1_164, %c0_165] : memref<6x128xf32, #tpu.memory_space<vmem>>, vector<4x128xf32>
    %c0_166 = arith.constant 0 : index
    %c0_167 = arith.constant 0 : index
    %146 = vector.load %arg30[%c0_166, %c0_167] : memref<6x128xf32, #tpu.memory_space<vmem>>, vector<4x128xf32>
    %c1_168 = arith.constant 1 : index
    %c0_169 = arith.constant 0 : index
    %147 = vector.load %arg30[%c1_168, %c0_169] : memref<6x128xf32, #tpu.memory_space<vmem>>, vector<4x128xf32>
    %c2_170 = arith.constant 2 : index
    %c0_171 = arith.constant 0 : index
    %148 = vector.load %arg30[%c2_170, %c0_171] : memref<6x128xf32, #tpu.memory_space<vmem>>, vector<4x128xf32>
    %149 = tpu.concatenate %146, %147, %148 in 1 : vector<4x128xf32>, vector<4x128xf32>, vector<4x128xf32> -> vector<4x384xf32>
    %150 = arith.truncf %149 : vector<4x384xf32> to vector<4x384xbf16>
    %c0_172 = arith.constant 0 : index
    %c0_173 = arith.constant 0 : index
    %151 = vector.load %arg19[%c0_172, %c0_173] : memref<384x128xbf16, #tpu.memory_space<vmem>>, vector<384x128xbf16>
    %cst_174 = arith.constant dense<0.000000e+00> : vector<4x128xf32>
    %152 = tpu.matmul %150, %151, %cst_174 {dimension_numbers = #tpu.dot_dimension_numbers<[1], [0], [0], [1], [0, 0, 1, 1], [], []>} : vector<4x384xbf16>, vector<384x128xbf16>, vector<4x128xf32> -> vector<4x128xf32>
    %c0_175 = arith.constant 0 : index
    %c0_176 = arith.constant 0 : index
    %153 = vector.load %arg20[%c0_175, %c0_176] : memref<1x128xf32, #tpu.memory_space<vmem>>, vector<1x128xf32>
    %154 = vector.broadcast %153 : vector<1x128xf32> to vector<4x128xf32>
    %155 = arith.addf %152, %154 : vector<4x128xf32>
    %156 = arith.addf %155, %145 : vector<4x128xf32>
    %cst_177 = arith.constant 0.000000e+00 : f32
    %157 = vector.broadcast %cst_177 : f32 to vector<4x128xf32>
    %158 = arith.maximumf %156, %157 : vector<4x128xf32>
    %cst_178 = arith.constant dense<0.000000e+00> : vector<128xf32>
    %159 = vector.multi_reduction <add>, %158, %cst_178 [0] : vector<4x128xf32> to vector<128xf32>
    %160 = vector.shape_cast %159 : vector<128xf32> to vector<1x128xf32>
    %cst_179 = arith.constant 4.000000e+00 : f32
    %161 = vector.broadcast %cst_179 : f32 to vector<1x128xf32>
    %162 = arith.divf %160, %161 : vector<1x128xf32>
    %163 = arith.truncf %162 : vector<1x128xf32> to vector<1x128xbf16>
    %c0_180 = arith.constant 0 : index
    %c0_181 = arith.constant 0 : index
    %164 = vector.load %arg21[%c0_180, %c0_181] : memref<128x128xbf16, #tpu.memory_space<vmem>>, vector<128x128xbf16>
    %cst_182 = arith.constant dense<0.000000e+00> : vector<1x128xf32>
    %165 = tpu.matmul %163, %164, %cst_182 {dimension_numbers = #tpu.dot_dimension_numbers<[1], [0], [0], [1], [0, 0, 1, 1], [], []>} : vector<1x128xbf16>, vector<128x128xbf16>, vector<1x128xf32> -> vector<1x128xf32>
    %c0_183 = arith.constant 0 : index
    %c0_184 = arith.constant 0 : index
    %166 = vector.load %arg22[%c0_183, %c0_184] : memref<1x128xf32, #tpu.memory_space<vmem>>, vector<1x128xf32>
    %167 = arith.addf %165, %166 : vector<1x128xf32>
    %c0_185 = arith.constant 0 : index
    %c0_186 = arith.constant 0 : index
    %c0_187 = arith.constant 0 : index
    %168 = vector.load %arg23[%c0_185, %c0_186, %c0_187] : memref<1x1x128xf32, #tpu.memory_space<vmem>>, vector<1x1x128xf32>
    %169 = vector.shape_cast %168 : vector<1x1x128xf32> to vector<1x128xf32>
    %170 = vector.shape_cast %167 : vector<1x128xf32> to vector<1x1x128xf32>
    tpu.vector_store %arg23[%c0_185, %c0_186, %c0_187], %170 {strides = array<i32>} : memref<1x1x128xf32, #tpu.memory_space<vmem>>, vector<1x1x128xf32>,
    return
  }
  func.func @transform_0(%arg0: i32) -> (i32, i32, i32) {
    %c0_i32 = arith.constant 0 : i32
    %c0_i32_0 = arith.constant 0 : i32
    %c0_i32_1 = arith.constant 0 : i32
    return %arg0, %c0_i32, %c0_i32_0 : i32, i32, i32
  }
  func.func @transform_1(%arg0: i32) -> (i32, i32) {
    %c0_i32 = arith.constant 0 : i32
    %c0_i32_0 = arith.constant 0 : i32
    %c0_i32_1 = arith.constant 0 : i32
    return %c0_i32, %c0_i32_0 : i32, i32
  }
  func.func @transform_2(%arg0: i32) -> (i32, i32) {
    %c0_i32 = arith.constant 0 : i32
    %c0_i32_0 = arith.constant 0 : i32
    %c0_i32_1 = arith.constant 0 : i32
    return %c0_i32, %c0_i32_0 : i32, i32
  }
  func.func @transform_3(%arg0: i32) -> (i32, i32) {
    %c0_i32 = arith.constant 0 : i32
    %c0_i32_0 = arith.constant 0 : i32
    %c0_i32_1 = arith.constant 0 : i32
    return %c0_i32, %c0_i32_0 : i32, i32
  }
  func.func @transform_4(%arg0: i32) -> (i32, i32) {
    %c0_i32 = arith.constant 0 : i32
    %c0_i32_0 = arith.constant 0 : i32
    %c0_i32_1 = arith.constant 0 : i32
    return %c0_i32, %c0_i32_0 : i32, i32
  }
  func.func @transform_5(%arg0: i32) -> (i32, i32) {
    %c0_i32 = arith.constant 0 : i32
    %c0_i32_0 = arith.constant 0 : i32
    %c0_i32_1 = arith.constant 0 : i32
    return %c0_i32, %c0_i32_0 : i32, i32
  }
  func.func @transform_6(%arg0: i32) -> (i32, i32) {
    %c0_i32 = arith.constant 0 : i32
    %c0_i32_0 = arith.constant 0 : i32
    %c0_i32_1 = arith.constant 0 : i32
    return %c0_i32, %c0_i32_0 : i32, i32
  }
  func.func @transform_7(%arg0: i32) -> (i32, i32) {
    %c0_i32 = arith.constant 0 : i32
    %c0_i32_0 = arith.constant 0 : i32
    %c0_i32_1 = arith.constant 0 : i32
    return %c0_i32, %c0_i32_0 : i32, i32
  }
  func.func @transform_8(%arg0: i32) -> (i32, i32) {
    %c0_i32 = arith.constant 0 : i32
    %c0_i32_0 = arith.constant 0 : i32
    %c0_i32_1 = arith.constant 0 : i32
    return %c0_i32, %c0_i32_0 : i32, i32
  }
  func.func @transform_9(%arg0: i32) -> (i32, i32) {
    %c0_i32 = arith.constant 0 : i32
    %c0_i32_0 = arith.constant 0 : i32
    %c0_i32_1 = arith.constant 0 : i32
    return %c0_i32, %c0_i32_0 : i32, i32
  }
  func.func @transform_10(%arg0: i32) -> (i32, i32) {
    %c0_i32 = arith.constant 0 : i32
    %c0_i32_0 = arith.constant 0 : i32
    %c0_i32_1 = arith.constant 0 : i32
    return %c0_i32, %c0_i32_0 : i32, i32
  }
  func.func @transform_11(%arg0: i32) -> (i32, i32) {
    %c0_i32 = arith.constant 0 : i32
    %c0_i32_0 = arith.constant 0 : i32
    %c0_i32_1 = arith.constant 0 : i32
    return %c0_i32, %c0_i32_0 : i32, i32
  }
  func.func @transform_12(%arg0: i32) -> (i32, i32) {
    %c0_i32 = arith.constant 0 : i32
    %c0_i32_0 = arith.constant 0 : i32
    %c0_i32_1 = arith.constant 0 : i32
    return %c0_i32, %c0_i32_0 : i32, i32
  }
  func.func @transform_13(%arg0: i32) -> (i32, i32) {
    %c0_i32 = arith.constant 0 : i32
    %c0_i32_0 = arith.constant 0 : i32
    %c0_i32_1 = arith.constant 0 : i32
    return %c0_i32, %c0_i32_0 : i32, i32
  }
  func.func @transform_14(%arg0: i32) -> (i32, i32) {
    %c0_i32 = arith.constant 0 : i32
    %c0_i32_0 = arith.constant 0 : i32
    %c0_i32_1 = arith.constant 0 : i32
    return %c0_i32, %c0_i32_0 : i32, i32
  }
  func.func @transform_15(%arg0: i32) -> (i32, i32) {
    %c0_i32 = arith.constant 0 : i32
    %c0_i32_0 = arith.constant 0 : i32
    %c0_i32_1 = arith.constant 0 : i32
    return %c0_i32, %c0_i32_0 : i32, i32
  }
  func.func @transform_16(%arg0: i32) -> (i32, i32) {
    %c0_i32 = arith.constant 0 : i32
    %c0_i32_0 = arith.constant 0 : i32
    %c0_i32_1 = arith.constant 0 : i32
    return %c0_i32, %c0_i32_0 : i32, i32
  }
  func.func @transform_17(%arg0: i32) -> (i32, i32) {
    %c0_i32 = arith.constant 0 : i32
    %c0_i32_0 = arith.constant 0 : i32
    %c0_i32_1 = arith.constant 0 : i32
    return %c0_i32, %c0_i32_0 : i32, i32
  }
  func.func @transform_18(%arg0: i32) -> (i32, i32) {
    %c0_i32 = arith.constant 0 : i32
    %c0_i32_0 = arith.constant 0 : i32
    %c0_i32_1 = arith.constant 0 : i32
    return %c0_i32, %c0_i32_0 : i32, i32
  }
  func.func @transform_19(%arg0: i32) -> (i32, i32) {
    %c0_i32 = arith.constant 0 : i32
    %c0_i32_0 = arith.constant 0 : i32
    %c0_i32_1 = arith.constant 0 : i32
    return %c0_i32, %c0_i32_0 : i32, i32
  }
  func.func @transform_20(%arg0: i32) -> (i32, i32) {
    %c0_i32 = arith.constant 0 : i32
    %c0_i32_0 = arith.constant 0 : i32
    %c0_i32_1 = arith.constant 0 : i32
    return %c0_i32, %c0_i32_0 : i32, i32
  }
  func.func @transform_21(%arg0: i32) -> (i32, i32) {
    %c0_i32 = arith.constant 0 : i32
    %c0_i32_0 = arith.constant 0 : i32
    %c0_i32_1 = arith.constant 0 : i32
    return %c0_i32, %c0_i32_0 : i32, i32
  }
  func.func @transform_22(%arg0: i32) -> (i32, i32, i32) {
    %c0_i32 = arith.constant 0 : i32
    %c0_i32_0 = arith.constant 0 : i32
    %c0_i32_1 = arith.constant 0 : i32
    return %arg0, %c0_i32, %c0_i32_0 : i32, i32, i32
  }
}

</mosaic_0001>

<bundles_post_ra>
// kernel: resnet1d_small_forward.1
= control target key start
LH: loop header
LB: loop body
LE: loop exit
PB: predicated region body
PF: predicated region fallthrough
CT: control target
= control target key end

     0   :  { %s4074_s0 = inlined_call_operand.vmem [shape: f32[2,36,4], index: 0, kind: input, shape index: {}]   ;;  %s4075_s1 = inlined_call_operand.vmem [shape: bf16[20,64], index: 1, kind: input, shape index: {}]   ;;  %s4076_s2 = inlined_call_operand.vmem [shape: f32[1,64], index: 2, kind: input, shape index: {}]   ;;  %s4077_s3 = inlined_call_operand.vmem [shape: bf16[192,64], index: 3, kind: input, shape index: {}]   ;;  %s4078_s4 = inlined_call_operand.vmem [shape: f32[1,64], index: 4, kind: input, shape index: {}]   ;;  %s4079_s5 = inlined_call_operand.vmem [shape: bf16[192,64], index: 5, kind: input, shape index: {}]   ;;  %s4080_s6 = inlined_call_operand.vmem [shape: f32[1,64], index: 6, kind: input, shape index: {}]   ;;  %s4081_s7 = inlined_call_operand.vmem [shape: bf16[192,64], index: 7, kind: input, shape index: {}]   ;;  %s4082_s8 = inlined_call_operand.vmem [shape: f32[1,64], index: 8, kind: input, shape index: {}]   ;;  %s4083_s9 = inlined_call_operand.vmem [shape: bf16[192,64], index: 9, kind: input, shape index: {}]   ;;  %s4084_s10 = inlined_call_operand.vmem [shape: f32[1,64], index: 10, kind: input, shape index: {}]   ;;  %s4085_s11 = inlined_call_operand.vmem [shape: bf16[64,128], index: 11, kind: input, shape index: {}]   ;;  %s4086_s12 = inlined_call_operand.vmem [shape: bf16[192,128], index: 12, kind: input, shape index: {}]   ;;  %s4087_s13 = inlined_call_operand.vmem [shape: f32[1,128], index: 13, kind: input, shape index: {}]   ;;  %s4088_s14 = inlined_call_operand.vmem [shape: bf16[384,128], index: 14, kind: input, shape index: {}]   ;;  %s4089_s15 = inlined_call_operand.vmem [shape: f32[1,128], index: 15, kind: input, shape index: {}]   ;;  %s4090_s16 = inlined_call_operand.vmem [shape: bf16[384,128], index: 16, kind: input, shape index: {}]   ;;  %s4091_s17 = inlined_call_operand.vmem [shape: f32[1,128], index: 17, kind: input, shape index: {}]   ;;  %s4092_s18 = inlined_call_operand.vmem [shape: bf16[384,128], index: 18, kind: input, shape index: {}]   ;;  %s4093_s19 = inlined_call_operand.vmem [shape: f32[1,128], index: 19, kind: input, shape index: {}]   ;;  %s4094_s20 = inlined_call_operand.vmem [shape: bf16[128,128], index: 20, kind: input, shape index: {}]   ;;  %s4095_s21 = inlined_call_operand.vmem [shape: f32[1,128], index: 21, kind: input, shape index: {}]   ;;  %s4096_s22 = inlined_call_operand.hbm [shape: f32[2,1,128], index: 22, kind: output, shape index: {}]  }
   0x1   :  { %4111 = sst [smem:[#allocation19_spill]] %s4074_s0 }
   0x2   :  { %4112 = sst [smem:[#allocation20_spill]] %s4075_s1 }
   0x3   :  { %4113 = sst [smem:[#allocation21_spill]] %s4076_s2 }
   0x4   :  { %4114 = sst [smem:[#allocation22_spill]] %s4077_s3 }
   0x5   :  { %4115 = sst [smem:[#allocation23_spill]] %s4078_s4 }
   0x6   :  { %4116 = sst [smem:[#allocation24_spill]] %s4079_s5 }
   0x7   :  { %4117 = sst [smem:[#allocation25_spill]] %s4080_s6 }
   0x8   :  { %4118 = sst [smem:[#allocation26_spill]] %s4081_s7 }
   0x9   :  { %27 = vsyncpa [#allocation11], 0 }
   0xa   :  { %29 = vsyncpa [#allocation11 + $0x1], 0  ;;  %s3481_s3 = smov 0   ;;  %s3483_s28 = smov 0  }
   0xb   :  { %s3485_s29 = smov 0   ;;  %s3487_s30 = smov 0  }
   0xc LB: > { %4119 = sst [smem:[#allocation13_spill]] %s3345_s3  ;;  %s3502_s4 = sadd.s32 4294967295, %s3357_s30   ;;  %s3357_s30 = sphi %s3487_s30, %s4139_s30   ;;  %s3353_s29 = sphi %s3485_s29, %s4141_s29   ;;  %s3349_s28 = sphi %s3483_s28, %s4143_s28   ;;  %s3345_s3 = sphi %s3481_s3, %s4142_s3  }
   0xd   : > { %4120 = sst [smem:[#allocation14_spill]] %s3353_s29  ;;  %s2478_s0 = sadd.s32 4294967294, %s3357_s30  }
   0xe   : > { %4121 = sst [smem:[#allocation15_spill]] %s3357_s30  ;;  %s3506_s23 = sadd.s32 1, %s3357_s30  }
   0xf   : > { %4122 = sst [smem:[#allocation16_spill]] %s3506_s23  ;;  %s509_s1 = sadd.s32 1, %s3353_s29 }
  0x10   : > { %s506_s5 = ssub.s32 %s3357_s30, %s3506_s23  ;;  %p519_p0 = scmp.ne.s32.totalorder %s3353_s29, %s3349_s28 }
  0x11   : > { %p507_p1 = scmp.eq.s32.totalorder %s506_s5, 0  ;;  %p520_p2 = scmp.eq.s32.totalorder %s3502_s4, 1 }
  0x12   : > { %p525_p3 = scmp.ne.s32.totalorder %s3349_s28, %s3345_s3  ;;  %p526_p4 = scmp.eq.s32.totalorder %s2478_s0, 1 }
  0x13   : > { %s3517_s24 = scalar_select %p507_p1, %s3353_s29, %s509_s1  }
  0x14   : > { %p3519_p5 = por %p520_p2, %p519_p0  ;;  %p3523_p6 = por %p526_p4, %p525_p3 }
  0x15   : > { %4123 = sst [smem:[#allocation17_spill]] %s3517_s24  ;;  %p2481_p7 = scmp.ge.s32.totalorder %s3357_s30, 1 }
  0x16   : > { %s4125_s25 = scalar_select %p3523_p6, 1, 0 }
  0x17   : > { %p615_p8 = scmp.lt.s32.totalorder %s3357_s30, 3 }
  0x18   : > { %4126 = sst [smem:[#allocation18_spill]] %s4125_s25 }
  0x19   : > { %p616_p9 = pnand %p2481_p7, %p615_p8 }
  0x1a   : > { %p676_p10 = scmp.lt.s32.totalorder (!%p616_p9), %s3502_s4, 1  ;;  %s4127_s1 = sld [smem:[#allocation19_spill]] (!%p616_p9) }
  0x1b   : > { %619 = sbr.rel (%p616_p9) target bundleno = 2174 (0x87e), region = 108  ;;  %s3361_s27 = smov (!%p616_p9), 8  }
  0x1c   : > { %s3362_s0 = smov (!%p616_p9), 16   ;;  %s4128_s24 = sld [smem:[#allocation20_spill]] (!%p616_p9) }
  0x1d   : > { %s4106_s3 = smov (!%p616_p9), 64   ;;  %s4132_s30 = sld [smem:[#allocation23_spill]] (!%p616_p9) }
  0x1e   : > { %s4134_s7 = sld [smem:[#allocation26_spill]] (!%p616_p9)  ;;  %s674_s29 = sand.u32 (!%p616_p9), 1, %s3349_s28  }
  0x1f   : > { %s675_s25 = scalar_lea.vmem (!%p616_p9), [#allocation10], %s674_s29 }
  0x20   : > { %s677_s26 = scalar_select %p676_p10, %s3502_s4, 1  ;;  %vm702_vm0 = vcmask 31744   ;;  %vm707_vm1 = vcmask 27648   ;;  %vm792_vm2 = vcmask 1041408   ;;  %vm762_vm3 = vcmask 64512  }
  0x21   : > { %vm765_vm4 = vcmask 97280   ;;  %vm768_vm5 = vcmask 130048   ;;  %vm788_vm6 = vcmask 162816   ;;  %vm682_vm7 = vcmask 516096  }
  0x22   : > { %s3217_s2 = smul.u32 40, %s677_s26  ;;  %s3359_s26 = smov 4   ;;  %v774_v17 = vld [vmem:[%s4128_s24 + $0x8] sm:$0x3]  ;;  %v3072_v21 = vld [vmem:[%s4128_s24] sm:$0xff]  ;;  %v3363_v45 = vmov 0.0  }
  0x23   : > { %v784_v18 = vunpack.c.l.b16 %v774_v17  ;;  %683 = vst.msk [vmem:[#allocation3] sm:$0x1] %vm682_vm7, %v3363_v45  ;;  %vm812_vm8 = vcmask 523264   ;;  %vm2314_vm9 = vcmask 1043456  }
  0x24   : > { %s680_s5 = scalar_lea.vmem %s4127_s1, %s3217_s2  ;;  %s3360_s2 = smov 12   ;;  %685 = vst.msk [vmem:[#allocation4] sm:$0x1] %vm682_vm7, %v3363_v45 }
  0x25   : > { %v697_v0 = vld [vmem:[%s680_s5] sm:$0xff]  ;;  %v698_v1 = vld [vmem:[%s680_s5 + $0x8] sm:$0xff]  ;;  %v699_v2 = vld [vmem:[%s680_s5 + $0x10] sm:$0xff]  ;;  %v786_v19 = vpack.c.b16 %v784_v18, %v784_v18  ;;  %686 = vst.msk [vmem:[#allocation4 + $0x9] sm:$0x1] %vm682_vm7, %v3363_v45  ;;  %s4129_s1 = sld [smem:[#allocation22_spill]] }
  0x26   : > { %v700_v3 = vld [vmem:[%s680_s5 + $0x18] sm:$0xff]  ;;  %703 = vst.msk [vmem:[#allocation2] sm:$0xff] %vm702_vm0, %v697_v0  ;;  %v701_v4 = vld [vmem:[%s680_s5 + $0x20] sm:$0xf]  ;;  %s2411_s5 = scalar_lea.sflag [#allocation11], %s674_s29 }
  0x27   : > { %704 = vst.msk [vmem:[#allocation2 + $0x8] sm:$0xff] %vm702_vm0, %v698_v1  ;;  %v794_v20 = vsel %vm792_vm2, %v786_v19, 0 }
  0x28   : > { %705 = vst.msk [vmem:[#allocation2 + $0x10] sm:$0xff] %vm702_vm0, %v699_v2  ;;  %802 = vmatpush.bf16.msra.mxu0 %v794_v20 }
  0x29   : > { %706 = vst.msk [vmem:[#allocation2 + $0x18] sm:$0xff] %vm702_vm0, %v700_v3 }
  0x2a   : > { %708 = vst.msk [vmem:[#allocation2 + $0x20] sm:$0xf] %vm707_vm1, %v701_v4 }
  0x2b   : > { %687 = vst.msk [vmem:[#allocation5] sm:$0x1] %vm682_vm7, %v3363_v45  ;;  %v3084_v46 = vld [vmem:[%s4129_s1 + $0x58] sm:$0xff]  ;;  %v3083_v47 = vld [vmem:[%s4129_s1 + $0x50] sm:$0xff]  ;;  %v3082_v48 = vld [vmem:[%s4129_s1 + $0x48] sm:$0xff] }
  0x2c   : > { %803 = vmatpush.bf16.msra.mxu0 %v3072_v21  ;;  %688 = vst.msk [vmem:[#allocation5 + $0x9] sm:$0x1] %vm682_vm7, %v3363_v45  ;;  %953 = vmatpush.bf16.msra.mxu2 %v3084_v46  ;;  %v3081_v49 = vld [vmem:[%s4129_s1 + $0x40] sm:$0xff]  ;;  %v3080_v54 = vld [vmem:[%s4129_s1 + $0x38] sm:$0xff]  ;;  %v3079_v55 = vld [vmem:[%s4129_s1 + $0x30] sm:$0xff] }
  0x2d   : > { %689 = vst.msk [vmem:[#allocation6] sm:$0x1] %vm682_vm7, %v3363_v45  ;;  %936 = vmatpush.bf16.msra.mxu1 %v3080_v54  ;;  %v3078_v58 = vld [vmem:[%s4129_s1 + $0x28] sm:$0xff]  ;;  %v3077_v60 = vld [vmem:[%s4129_s1 + $0x20] sm:$0xff]  ;;  %v3076_v61 = vld [vmem:[%s4129_s1 + $0x18] sm:$0xff] }
  0x2e   : > { %v713_v5 = vld [vmem:[#allocation2 + $0x1] ss:$2 sm:$0xff]  ;;  %v709_v27 = vld [vmem:[#allocation2] ss:$2 sm:$0xff]  ;;  %690 = vst.msk [vmem:[#allocation6 + $0x9] sm:$0x1] %vm682_vm7, %v3363_v45 }
  0x2f   : > { %v721_v6 = vld [vmem:[#allocation2 + $0x3] ss:$2 sm:$0xff]  ;;  %v717_v11 = vld [vmem:[#allocation2 + $0x2] ss:$2 sm:$0xff]  ;;  %691 = vst.msk [vmem:[#allocation7] sm:$0x1] %vm682_vm7, %v3363_v45 }
  0x30   : > { %v715_v7 = vld [vmem:[#allocation2 + $0x11] ss:$2 sm:$0xff]  ;;  %v725_v13 = vld [vmem:[#allocation2 + $0x4] ss:$2 sm:$0xff]  ;;  %693 = vst [vmem:[#allocation8] sm:$0x1] %v3363_v45  ;;  %954 = vmatpush.bf16.msra.mxu2 %v3083_v47 }
  0x31   : > { %v3264_v8 = vpack.i.bf16 %v715_v7, %v713_v5  ;;  %v723_v9 = vld [vmem:[#allocation2 + $0x13] ss:$2 sm:$0xff]  ;;  %v719_v12 = vld [vmem:[#allocation2 + $0x12] ss:$2 sm:$0xff]  ;;  %694 = vst [vmem:[#allocation8 + $0x5] sm:$0x1] %v3363_v45  ;;  %937 = vmatpush.bf16.msra.mxu1 %v3079_v55 }
  0x32   : > { %v3274_v10 = vpack.i.bf16 %v723_v9, %v721_v6  ;;  %v727_v14 = vld [vmem:[#allocation2 + $0x14] ss:$2 sm:$0xff]  ;;  %v3269_v15 = vpack.i.bf16 %v719_v12, %v717_v11  ;;  %695 = vst [vmem:[#allocation9] sm:$0x1] %v3363_v45  ;;  %v3074_v4 = vld [vmem:[%s4129_s1 + $0x8] sm:$0xff] }
  0x33   : > { %3265 = vrot.lane.b32.xlu0 %v3264_v8, %s3359_s26  ;;  %v3279_v16 = vpack.i.bf16 %v727_v14, %v725_v13  ;;  %v711_v26 = vld [vmem:[#allocation2 + $0x10] ss:$2 sm:$0xff]  ;;  %696 = vst [vmem:[#allocation9 + $0x5] sm:$0x1] %v3363_v45  ;;  %v3073_v8 = vld [vmem:[%s4129_s1] sm:$0xff] }
  0x34   : > { %3275 = vrot.lane.b32.xlu1 %v3274_v10, %s3360_s2  ;;  %955 = vmatpush.bf16.msra.mxu2 %v3082_v48  ;;  %v3075_v1 = vld [vmem:[%s4129_s1 + $0x10] sm:$0xff]  ;;  %v3105_v45 = vld [vmem:[%s4134_s7 + $0x40] sm:$0xff]  ;;  %v3104_v46 = vld [vmem:[%s4134_s7 + $0x38] sm:$0xff]  ;;  %s2421_s2 = sshll.u32 %s675_s25, 4  ;;  %s2422_s2 = int_to_ptr.vmem [resolvable:$true] %s2421_s2 }
  0x35   : > { %938 = vmatpush.bf16.msra.mxu1 %v3078_v58  ;;  %v3103_v47 = vld [vmem:[%s4134_s7 + $0x30] sm:$0xff]  ;;  %v3102_v48 = vld [vmem:[%s4134_s7 + $0x28] sm:$0xff] }
  0x38   : > { %956 = vmatpush.bf16.msra.mxu2 %v3081_v49 }
  0x39   : > { %939 = vmatpush.bf16.msra.mxu1 %v3077_v60 }
  0x3b   : > { %3270 = vrot.lane.b32.xlu0 %v3269_v15, %s3361_s27  ;;  %s4130_s27 = sld [smem:[#allocation21_spill]] }
  0x3c   : > { %3280 = vrot.lane.b32.xlu1 %v3279_v16, %s3362_s0  ;;  %1220 = vmatpush.bf16.msrb.mxu2 %v3104_v46 }
  0x3d   : > { %940 = vmatpush.bf16.msra.mxu1 %v3076_v61 }
  0x40   : > { %1221 = vmatpush.bf16.msrb.mxu2 %v3103_v47 }
  0x41   : > { %v3284_v50 = vld [vmem:[%s4130_s27] ss:$0 sm:$0xff]  ;;  %941 = vmatpush.bf16.msra.mxu1 %v3075_v1  ;;  %s4131_s27 = sld [smem:[#allocation24_spill]] }
  0x44   : > { %1222 = vmatpush.bf16.msrb.mxu2 %v3102_v48  ;;  %v3128_v48 = vld [vmem:[%s4086_s12 + $0x18] sm:$0xff] }
  0x45   : > { %942 = vmatpush.bf16.msra.mxu1 %v3074_v4 }
  0x47   : > { %v3096_v15 = vld [vmem:[%s4131_s27 + $0x58] sm:$0xff]  ;;  %v3095_v16 = vld [vmem:[%s4131_s27 + $0x50] sm:$0xff]  ;;  %v3094_v17 = vld [vmem:[%s4131_s27 + $0x48] sm:$0xff] }
  0x48   : > { %1095 = vmatpush.bf16.msrb.mxu0 %v3096_v15  ;;  %v3093_v18 = vld [vmem:[%s4131_s27 + $0x40] sm:$0xff]  ;;  %v3092_v19 = vld [vmem:[%s4131_s27 + $0x38] sm:$0xff]  ;;  %v3091_v20 = vld [vmem:[%s4131_s27 + $0x30] sm:$0xff] }
  0x49   : > { %943 = vmatpush.bf16.msra.mxu1 %v3073_v8  ;;  %1078 = vmatpush.bf16.msra.mxu3 %v3092_v19  ;;  %v3090_v21 = vld [vmem:[%s4131_s27 + $0x28] sm:$0xff]  ;;  %v3112_v15 = vld [vmem:[%s4083_s9 + $0x18] sm:$0xff]  ;;  %v3111_v19 = vld [vmem:[%s4083_s9 + $0x10] sm:$0xff] }
  0x4a   : > { %v3118_v8 = vld [vmem:[%s4083_s9 + $0x48] sm:$0xff] }
  0x4c   : > { %1096 = vmatpush.bf16.msrb.mxu0 %v3095_v16 }
  0x4d   : > { %1079 = vmatpush.bf16.msra.mxu3 %v3091_v20 }
  0x50   : > { %1097 = vmatpush.bf16.msrb.mxu0 %v3094_v17 }
  0x51   : > { %1080 = vmatpush.bf16.msra.mxu3 %v3090_v21  ;;  %v3110_v21 = vld [vmem:[%s4083_s9 + $0x8] sm:$0xff] }
  0x54   : > { %1098 = vmatpush.bf16.msrb.mxu0 %v3093_v18 }
  0xa5   : > { %v3266_v22 = vpop.permute.xlu0 %3265 }
  0xa6   : > { %v3276_v23 = vpop.permute.xlu1 %3275  ;;  %v3268_v24 = vunpack.i.h.bf16 %v3266_v22  ;;  %v3267_v25 = vunpack.i.l.bf16 %v3266_v22  ;;  %v3089_v22 = vld [vmem:[%s4131_s27 + $0x20] sm:$0xff] }
  0xa7   : > { %v3278_v29 = vunpack.i.h.bf16 %v3276_v23  ;;  %v3277_v30 = vunpack.i.l.bf16 %v3276_v23  ;;  %v3285_v23 = vld [vmem:[%s4132_s30] ss:$0 sm:$0xff]  ;;  %1081 = vmatpush.bf16.msra.mxu3 %v3089_v22  ;;  %s4133_s30 = smov 64  }
  0xa8   : > { %v761_v34 = vsel %vm702_vm0, %v711_v26, %v3268_v24  ;;  %v760_v35 = vsel %vm702_vm0, %v709_v27, %v3267_v25  ;;  %v3088_v24 = vld [vmem:[%s4131_s27 + $0x18] sm:$0xff] }
  0xab   : > { %1082 = vmatpush.bf16.msra.mxu3 %v3088_v24 }
  0xad   : > { %v3271_v28 = vpop.permute.xlu0 %3270 }
  0xae   : > { %v3273_v31 = vunpack.i.h.bf16 %v3271_v28  ;;  %v3272_v32 = vunpack.i.l.bf16 %v3271_v28  ;;  %v3281_v33 = vpop.permute.xlu1 %3280  ;;  %v3087_v28 = vld [vmem:[%s4131_s27 + $0x10] sm:$0xff] }
  0xaf   : > { %v3283_v36 = vunpack.i.h.bf16 %v3281_v33  ;;  %v3282_v37 = vunpack.i.l.bf16 %v3281_v33  ;;  %1083 = vmatpush.bf16.msra.mxu3 %v3087_v28 }
  0xb0   : > { %v763_v38 = vsel %vm762_vm3, %v760_v35, %v3272_v32  ;;  %v764_v39 = vsel %vm762_vm3, %v761_v34, %v3273_v31  ;;  %v3085_v35 = vld [vmem:[%s4131_s27] sm:$0xff] }
  0xb1   : > { %v766_v40 = vsel %vm765_vm4, %v763_v38, %v3277_v30  ;;  %v767_v41 = vsel %vm765_vm4, %v764_v39, %v3278_v29  ;;  %v3086_v30 = vld [vmem:[%s4131_s27 + $0x8] sm:$0xff]  ;;  %s4135_s27 = sld [smem:[#allocation25_spill]] }
  0xb2   : > { %v769_v42 = vsel %vm768_vm5, %v766_v40, %v3282_v37  ;;  %v770_v43 = vsel %vm768_vm5, %v767_v41, %v3283_v36 }
  0xb3   : > { %v771_v44 = vpack.c.bf16 %v770_v43, %v769_v42  ;;  %1084 = vmatpush.bf16.msra.mxu3 %v3086_v30  ;;  %v3108_v42 = vld [vmem:[%s4134_s7 + $0x58] sm:$0xff]  ;;  %v3107_v43 = vld [vmem:[%s4134_s7 + $0x50] sm:$0xff] }
  0xb5   : > { %2487 = vmatmul.msk.bf16.vlgmr.msra.gmra.mxu0 %vm788_vm6, %v771_v44  ;;  %v3106_v44 = vld [vmem:[%s4134_s7 + $0x48] sm:$0xff] }
  0xb6   : > { %1237 = vmatpush.bf16.msra.mxu0 %v3108_v42  ;;  %v3131_v42 = vld [vmem:[%s4086_s12 + $0x30] sm:$0xff] }
  0xb7   : > { %1085 = vmatpush.bf16.msra.mxu3 %v3085_v35  ;;  %v3286_v49 = vld [vmem:[%s4135_s27] ss:$0 sm:$0xff]  ;;  %v3123_v35 = vld [vmem:[%s4085_s11 + $0x10] sm:$0xff]  ;;  %s2419_s27 = scalar_lea.hbm %s4096_s22, %s3502_s4 }
  0xb8   : > { %s2423_s0 = sshll.u32 %s2419_s27, 4  ;;  %s2424_s0 = int_to_ptr.hbm [resolvable:$true] %s2423_s0 }
  0xb9   : > { %s3309_s24 = sshra.s32 %s2424_s0, 4  ;;  %s3310_s24 = int_to_ptr.hbm [resolvable:$true] %s3309_s24 }
  0xba   : > { %1238 = vmatpush.bf16.msra.mxu0 %v3107_v43  ;;  %v3130_v43 = vld [vmem:[%s4086_s12 + $0x28] sm:$0xff]  ;;  %s3311_s26 = scalar_lea.hbm %s3310_s24, 1  ;;  %p3316_p0 = scmp.lt.s32.totalorder %s3310_s24, %s4096_s22 }
  0xbb   : > { %p3312_p11 = scmp.ne.s32.totalorder %s3310_s24, %s3311_s26 }
  0xbd   : > { %p3313_p12 = pnand %p3312_p11, %p3519_p5 }
  0xbe   : > { %1239 = vmatpush.bf16.msra.mxu0 %v3106_v44  ;;  %v3288_v44 = vld [vmem:[%s4084_s10] ss:$0 sm:$0xff] }
  0xbf   : > { %p3314_p13 = pneg %p3313_p12 }
  0xc2   : > { %1240 = vmatpush.bf16.msra.mxu0 %v3105_v45  ;;  %v3129_v45 = vld [vmem:[%s4086_s12 + $0x20] sm:$0xff] }
 0x132   : > { %v805_v51 = vpop.f32.mrf.mxu0 }
 0x133   : > { %v806_v52 = vadd.f32 %v3284_v50, %v805_v51 }
 0x135   : > { %v810_v53 = vmax.f32 %v806_v52, 0.0 }
 0x137   : > { %813 = vst.msk [vmem:[#allocation3 + $0x1] sm:$0xff] %vm812_vm8, %v810_v53  ;;  %v3100_v53 = vld [vmem:[%s4134_s7 + $0x18] sm:$0xff] }
 0x13a   : > { %v807_v56 = vpop.f32.mrf.mxu0 }
 0x13b   : > { %v808_v57 = vadd.f32 %v3284_v50, %v807_v56  ;;  %v3101_v50 = vld [vmem:[%s4134_s7 + $0x20] sm:$0xff]  ;;  %v3099_v56 = vld [vmem:[%s4134_s7 + $0x10] sm:$0xff] }
 0x13c   : > { %1223 = vmatpush.bf16.msrb.mxu2 %v3101_v50 }
 0x13d   : > { %v811_v59 = vmax.f32 %v808_v57, 0.0 }
 0x13f   : > { %814 = vst.msk [vmem:[#allocation3 + $0x9] sm:$0xff] %vm812_vm8, %v811_v59  ;;  %v3098_v59 = vld [vmem:[%s4134_s7 + $0x8] sm:$0xff] }
 0x140   : > { %1224 = vmatpush.bf16.msrb.mxu2 %v3100_v53 }
 0x144   : > { %1225 = vmatpush.bf16.msrb.mxu2 %v3099_v56 }
 0x146   : > { %v815_v62 = vld [vmem:[#allocation3] ss:$2 sm:$0xff]  ;;  %v817_v63 = vld [vmem:[#allocation3 + $0x1] ss:$2 sm:$0xff] }
 0x147   : > { %v820_v0 = vmax.f32 %v815_v62, %v817_v63  ;;  %v819_v2 = vld [vmem:[#allocation3 + $0x2] ss:$2 sm:$0xff]  ;;  %v3097_v63 = vld [vmem:[%s4134_s7] sm:$0xff] }
 0x148   : > { %1226 = vmatpush.bf16.msrb.mxu2 %v3098_v59  ;;  %v3125_v59 = vld [vmem:[%s4086_s12] sm:$0xff] }
 0x149   : > { %v821_v3 = vmax.f32 %v820_v0, %v819_v2 }
 0x14b   : > { %822 = vst.msk [vmem:[#allocation4 + $0x1] sm:$0xff] %vm812_vm8, %v821_v3 }
 0x14c   : > { %1227 = vmatpush.bf16.msrb.mxu2 %v3097_v63 }
 0x152   : > { %v3585_v5 = vld [vmem:[#allocation4 + $0x1] sm:$0xff] }
 0x153   : > { %v825_v6 = vld [vmem:[#allocation4 + $0x2] sm:$0xff]  ;;  %827 = vrot.lane.b32.xlu2 %v3585_v5, %s4106_s3 }
 0x154   : > { %v832_v7 = vpack.c.bf16 %v825_v6, %v825_v6  ;;  %v823_v10 = vld [vmem:[#allocation4] sm:$0xff]  ;;  %v3120_v6 = vld [vmem:[%s4083_s9 + $0x58] sm:$0xff] }
 0x155   : > { %1379 = vmatpush.bf16.msrb.mxu3 %v3120_v6  ;;  %v3142_v6 = vld [vmem:[%s4088_s14 + $0x28] sm:$0xff] }
 0x156   : > { %2536 = vmatmul.msk.bf16.vlgmr.msra.gmra.mxu2 %vm812_vm8, %v832_v7  ;;  %v3119_v7 = vld [vmem:[%s4083_s9 + $0x50] sm:$0xff] }
 0x159   : > { %1380 = vmatpush.bf16.msrb.mxu3 %v3119_v7  ;;  %v3150_v7 = vld [vmem:[%s4088_s14 + $0x68] sm:$0xff] }
 0x15d   : > { %1381 = vmatpush.bf16.msrb.mxu3 %v3118_v8  ;;  %v3158_v8 = vld [vmem:[%s4088_s14 + $0xa8] sm:$0xff] }
 0x1ad   : > { %v828_v9 = vpop.permute.xlu2 %827 }
 0x1ae   : > { %v830_v11 = vsel %vm812_vm8, %v823_v10, %v828_v9  ;;  %v3117_v9 = vld [vmem:[%s4083_s9 + $0x40] sm:$0xff]  ;;  %v3116_v10 = vld [vmem:[%s4083_s9 + $0x38] sm:$0xff] }
 0x1af   : > { %v831_v12 = vpack.c.bf16 %v830_v11, %v830_v11  ;;  %1382 = vmatpush.bf16.msrb.mxu3 %v3117_v9  ;;  %1362 = vmatpush.bf16.msrb.mxu1 %v3116_v10  ;;  %v3115_v11 = vld [vmem:[%s4083_s9 + $0x30] sm:$0xff]  ;;  %v3141_v9 = vld [vmem:[%s4088_s14 + $0x20] sm:$0xff] }
 0x1b0   : > { %v3149_v10 = vld [vmem:[%s4088_s14 + $0x60] sm:$0xff] }
 0x1b1   : > { %944 = vmatmul.bf16.vlgmr.msra.gmra.mxu1 %v831_v12  ;;  %v3114_v12 = vld [vmem:[%s4083_s9 + $0x28] sm:$0xff] }
 0x1b3   : > { %1363 = vmatpush.bf16.msrb.mxu1 %v3115_v11  ;;  %v3157_v11 = vld [vmem:[%s4088_s14 + $0xa0] sm:$0xff] }
 0x1b7   : > { %1364 = vmatpush.bf16.msrb.mxu1 %v3114_v12 }
 0x1d9   : > { %v958_v13 = vpop.f32.mrf.mxu2 }
 0x1e1   : > { %v960_v14 = vpop.f32.mrf.mxu2 }
 0x1e2   : > { %v3287_v14 = vld [vmem:[%s4082_s8] ss:$0 sm:$0xff] }
 0x22e   : > { %v945_v25 = vpop.f32.mrf.mxu1 }
 0x22f   : > { %v946_v26 = vadd.f32 %v3285_v23, %v945_v25 }
 0x231   : > { %v959_v27 = vadd.f32 %v958_v13, %v946_v26  ;;  %v3113_v13 = vld [vmem:[%s4083_s9 + $0x20] sm:$0xff] }
 0x232   : > { %1365 = vmatpush.bf16.msrb.mxu1 %v3113_v13  ;;  %v3109_v26 = vld [vmem:[%s4083_s9] sm:$0xff] }
 0x233   : > { %v962_v29 = vmax.f32 %v959_v27, 0.0 }
 0x235   : > { %963 = vst.msk [vmem:[#allocation5 + $0x1] sm:$0xff] %vm812_vm8, %v962_v29 }
 0x236   : > { %v947_v31 = vpop.f32.mrf.mxu1  ;;  %1366 = vmatpush.bf16.msrb.mxu1 %v3112_v15 }
 0x23a   : > { %1367 = vmatpush.bf16.msrb.mxu1 %v3111_v19  ;;  %v3139_v19 = vld [vmem:[%s4088_s14 + $0x10] sm:$0xff] }
 0x23c   : > { %v966_v32 = vld [vmem:[#allocation5 + $0x1] sm:$0xff] }
 0x23d   : > { %v967_v33 = vld [vmem:[#allocation5 + $0x2] sm:$0xff]  ;;  %969 = vrot.lane.b32.xlu2 %v966_v32, %s4133_s30 }
 0x23e   : > { %v974_v34 = vpack.c.bf16 %v967_v33, %v967_v33  ;;  %v965_v37 = vld [vmem:[#allocation5] sm:$0xff]  ;;  %1368 = vmatpush.bf16.msrb.mxu1 %v3110_v21  ;;  %v3124_v33 = vld [vmem:[%s4085_s11 + $0x18] sm:$0xff] }
 0x23f   : > { %v3155_v21 = vld [vmem:[%s4088_s14 + $0x90] sm:$0xff] }
 0x240   : > { %2585 = vmatmul.msk.bf16.vlgmr.msrb.gmra.mxu0 %vm812_vm8, %v974_v34  ;;  %v3136_v34 = vld [vmem:[%s4086_s12 + $0x58] sm:$0xff] }
 0x241   : > { %1433 = vmatpush.bf16.msrb.mxu0 %v3124_v33  ;;  %v3183_v33 = vld [vmem:[%s4090_s16 + $0xb0] sm:$0xff] }
 0x242   : > { %1369 = vmatpush.bf16.msrb.mxu1 %v3109_v26  ;;  %v3145_v26 = vld [vmem:[%s4088_s14 + $0x40] sm:$0xff] }
 0x245   : > { %1434 = vmatpush.bf16.msrb.mxu0 %v3123_v35 }
 0x297   : > { %v970_v36 = vpop.permute.xlu2 %969 }
 0x298   : > { %v972_v38 = vsel %vm812_vm8, %v965_v37, %v970_v36  ;;  %v3135_v36 = vld [vmem:[%s4086_s12 + $0x50] sm:$0xff]  ;;  %v3122_v37 = vld [vmem:[%s4085_s11 + $0x8] sm:$0xff] }
 0x299   : > { %v973_v39 = vpack.c.bf16 %v972_v38, %v972_v38  ;;  %v3134_v38 = vld [vmem:[%s4086_s12 + $0x48] sm:$0xff]  ;;  %1435 = vmatpush.bf16.msrb.mxu0 %v3122_v37 }
 0x29b   : > { %1086 = vmatmul.bf16.vlgmr.msra.gmra.mxu3 %v973_v39  ;;  %v3121_v39 = vld [vmem:[%s4085_s11] sm:$0xff] }
 0x29c   : > { %1572 = vmatpush.bf16.msra.mxu3 %v3136_v34  ;;  %v3289_v34 = vld [vmem:[%s4087_s13] ss:$0 sm:$0xff] }
 0x29d   : > { %1436 = vmatpush.bf16.msrb.mxu0 %v3121_v39 }
 0x2a0   : > { %1573 = vmatpush.bf16.msra.mxu3 %v3135_v36 }
 0x2a4   : > { %1574 = vmatpush.bf16.msra.mxu3 %v3134_v38 }
 0x2bd   : > { %v1100_v40 = vpop.f32.mrf.mxu0 }
 0x2c5   : > { %v1102_v41 = vpop.f32.mrf.mxu0 }
 0x2c6   : > { %v3132_v41 = vld [vmem:[%s4086_s12 + $0x38] sm:$0xff] }
 0x2c7   : > { %1555 = vmatpush.bf16.msra.mxu2 %v3132_v41 }
 0x2cb   : > { %1556 = vmatpush.bf16.msra.mxu2 %v3131_v42 }
 0x2cf   : > { %1557 = vmatpush.bf16.msra.mxu2 %v3130_v43 }
 0x2d3   : > { %1558 = vmatpush.bf16.msra.mxu2 %v3129_v45 }
 0x2d7   : > { %1559 = vmatpush.bf16.msra.mxu2 %v3128_v48  ;;  %v3182_v48 = vld [vmem:[%s4090_s16 + $0xa8] sm:$0xff] }
 0x31e   : > { %v1087_v51 = vpop.f32.mrf.mxu3 }
 0x31f   : > { %v1088_v52 = vadd.f32 %v3286_v49, %v1087_v51  ;;  %v3127_v51 = vld [vmem:[%s4086_s12 + $0x10] sm:$0xff] }
 0x320   : > { %1560 = vmatpush.bf16.msra.mxu2 %v3127_v51  ;;  %v3181_v51 = vld [vmem:[%s4090_s16 + $0xa0] sm:$0xff] }
 0x321   : > { %v1101_v54 = vadd.f32 %v1100_v40, %v1088_v52  ;;  %v3133_v40 = vld [vmem:[%s4086_s12 + $0x40] sm:$0xff] }
 0x322   : > { %1575 = vmatpush.bf16.msra.mxu3 %v3133_v40 }
 0x323   : > { %v1104_v55 = vadd.f32 %v1101_v54, %v3585_v5  ;;  %v3126_v54 = vld [vmem:[%s4086_s12 + $0x8] sm:$0xff] }
 0x324   : > { %1561 = vmatpush.bf16.msra.mxu2 %v3126_v54  ;;  %v3180_v54 = vld [vmem:[%s4090_s16 + $0x98] sm:$0xff] }
 0x325   : > { %v1105_v57 = vmax.f32 %v1104_v55, 0.0 }
 0x326   : > { %v1089_v58 = vpop.f32.mrf.mxu3 }
 0x327   : > { %1106 = vst.msk [vmem:[#allocation6 + $0x1] sm:$0xff] %vm812_vm8, %v1105_v57 }
 0x328   : > { %1562 = vmatpush.bf16.msra.mxu2 %v3125_v59  ;;  %v3170_v59 = vld [vmem:[%s4090_s16 + $0x48] sm:$0xff] }
 0x32e   : > { %v3675_v60 = vld [vmem:[#allocation6 + $0x1] sm:$0xff] }
 0x32f   : > { %v1109_v61 = vld [vmem:[#allocation6 + $0x2] sm:$0xff]  ;;  %1111 = vrot.lane.b32.xlu0 %v3675_v60, %s4133_s30 }
 0x330   : > { %v1116_v62 = vpack.c.bf16 %v1109_v61, %v1109_v61  ;;  %v1107_v1 = vld [vmem:[#allocation6] sm:$0xff] }
 0x332   : > { %2634 = vmatmul.msk.bf16.vlgmr.msra.gmra.mxu0 %vm812_vm8, %v1116_v62 }
 0x3a1   : > { %v1112_v0 = vpop.permute.xlu0 %1111 }
 0x3a2   : > { %v1114_v2 = vsel %vm812_vm8, %v1107_v1, %v1112_v0  ;;  %v3144_v0 = vld [vmem:[%s4088_s14 + $0x38] sm:$0xff] }
 0x3a3   : > { %v1115_v3 = vpack.c.bf16 %v1114_v2, %v1114_v2  ;;  %v3152_v1 = vld [vmem:[%s4088_s14 + $0x78] sm:$0xff]  ;;  %1785 = vmatpush.bf16.msra.mxu0 %v3144_v0 }
 0x3a4   : > { %v3160_v2 = vld [vmem:[%s4088_s14 + $0xb8] sm:$0xff]  ;;  %1798 = vmatpush.bf16.msra.mxu1 %v3152_v1 }
 0x3a5   : > { %1228 = vmatmul.bf16.vlgmr.msrb.gmra.mxu2 %v1115_v3  ;;  %v3143_v3 = vld [vmem:[%s4088_s14 + $0x30] sm:$0xff]  ;;  %v3192_v0 = vld [vmem:[%s4092_s18 + $0x38] sm:$0xff] }
 0x3a6   : > { %v3200_v1 = vld [vmem:[%s4092_s18 + $0x78] sm:$0xff] }
 0x3a7   : > { %1786 = vmatpush.bf16.msra.mxu0 %v3143_v3  ;;  %v3191_v3 = vld [vmem:[%s4092_s18 + $0x30] sm:$0xff] }
 0x3ab   : > { %1787 = vmatpush.bf16.msra.mxu0 %v3142_v6  ;;  %v3290_v6 = vld [vmem:[%s4089_s15] ss:$0 sm:$0xff] }
 0x3af   : > { %v1242_v4 = vpop.f32.mrf.mxu0  ;;  %1788 = vmatpush.bf16.msra.mxu0 %v3141_v9 }
 0x3b7   : > { %v1244_v5 = vpop.f32.mrf.mxu0 }
 0x3b8   : > { %v3159_v5 = vld [vmem:[%s4088_s14 + $0xb0] sm:$0xff] }
 0x428   : > { %v1229_v16 = vpop.f32.mrf.mxu2 }
 0x429   : > { %v1230_v17 = vadd.f32 %v3287_v14, %v1229_v16  ;;  %v3140_v16 = vld [vmem:[%s4088_s14 + $0x18] sm:$0xff] }
 0x42a   : > { %1789 = vmatpush.bf16.msra.mxu0 %v3140_v16 }
 0x42b   : > { %v1243_v18 = vadd.f32 %v1242_v4, %v1230_v17  ;;  %v3151_v4 = vld [vmem:[%s4088_s14 + $0x70] sm:$0xff]  ;;  %v3148_v17 = vld [vmem:[%s4088_s14 + $0x58] sm:$0xff] }
 0x42c   : > { %1799 = vmatpush.bf16.msra.mxu1 %v3151_v4  ;;  %v3199_v4 = vld [vmem:[%s4092_s18 + $0x70] sm:$0xff] }
 0x42d   : > { %v1246_v20 = vmax.f32 %v1243_v18, 0.0  ;;  %v3156_v18 = vld [vmem:[%s4088_s14 + $0x98] sm:$0xff] }
 0x42e   : > { %1790 = vmatpush.bf16.msra.mxu0 %v3139_v19 }
 0x42f   : > { %1247 = vst.msk [vmem:[#allocation5 + $0x1] sm:$0xff] %vm812_vm8, %v1246_v20  ;;  %v3147_v20 = vld [vmem:[%s4088_s14 + $0x50] sm:$0xff] }
 0x430   : > { %v1231_v22 = vpop.f32.mrf.mxu2  ;;  %1800 = vmatpush.bf16.msra.mxu1 %v3150_v7 }
 0x431   : > { %v3138_v22 = vld [vmem:[%s4088_s14 + $0x8] sm:$0xff] }
 0x432   : > { %1791 = vmatpush.bf16.msra.mxu0 %v3138_v22 }
 0x434   : > { %1801 = vmatpush.bf16.msra.mxu1 %v3149_v10 }
 0x436   : > { %v1250_v23 = vld [vmem:[#allocation5 + $0x1] sm:$0xff] }
 0x437   : > { %v1251_v24 = vld [vmem:[#allocation5 + $0x2] sm:$0xff]  ;;  %1253 = vrot.lane.b32.xlu1 %v1250_v23, %s4133_s30  ;;  %v3146_v23 = vld [vmem:[%s4088_s14 + $0x48] sm:$0xff] }
 0x438   : > { %v1258_v25 = vpack.c.bf16 %v1251_v24, %v1251_v24  ;;  %v1249_v28 = vld [vmem:[#allocation5] sm:$0xff]  ;;  %1802 = vmatpush.bf16.msra.mxu1 %v3148_v17  ;;  %v3154_v24 = vld [vmem:[%s4088_s14 + $0x88] sm:$0xff] }
 0x43a   : > { %2683 = vmatmul.msk.bf16.vlgmr.msrb.gmra.mxu3 %vm812_vm8, %v1258_v25  ;;  %v3137_v25 = vld [vmem:[%s4088_s14] sm:$0xff] }
 0x43b   : > { %1811 = vmatpush.bf16.msrb.mxu3 %v3160_v2  ;;  %1792 = vmatpush.bf16.msra.mxu0 %v3137_v25  ;;  %v3208_v2 = vld [vmem:[%s4092_s18 + $0xb8] sm:$0xff]  ;;  %v3190_v25 = vld [vmem:[%s4092_s18 + $0x28] sm:$0xff] }
 0x43c   : > { %1803 = vmatpush.bf16.msra.mxu1 %v3147_v20 }
 0x43f   : > { %1812 = vmatpush.bf16.msrb.mxu3 %v3159_v5  ;;  %v3207_v5 = vld [vmem:[%s4092_s18 + $0xb0] sm:$0xff] }
 0x440   : > { %1804 = vmatpush.bf16.msra.mxu1 %v3146_v23 }
 0x443   : > { %1813 = vmatpush.bf16.msrb.mxu3 %v3158_v8 }
 0x444   : > { %1805 = vmatpush.bf16.msra.mxu1 %v3145_v26  ;;  %v3206_v26 = vld [vmem:[%s4092_s18 + $0xa8] sm:$0xff] }
 0x447   : > { %1814 = vmatpush.bf16.msrb.mxu3 %v3157_v11 }
 0x44b   : > { %1815 = vmatpush.bf16.msrb.mxu3 %v3156_v18 }
 0x44f   : > { %1816 = vmatpush.bf16.msrb.mxu3 %v3155_v21 }
 0x453   : > { %1817 = vmatpush.bf16.msrb.mxu3 %v3154_v24 }
 0x4a9   : > { %v1254_v27 = vpop.permute.xlu1 %1253 }
 0x4aa   : > { %v1256_v29 = vsel %vm812_vm8, %v1249_v28, %v1254_v27  ;;  %v3153_v27 = vld [vmem:[%s4088_s14 + $0x80] sm:$0xff]  ;;  %v3168_v28 = vld [vmem:[%s4090_s16 + $0x38] sm:$0xff] }
 0x4ab   : > { %v1257_v30 = vpack.c.bf16 %v1256_v29, %v1256_v29  ;;  %1818 = vmatpush.bf16.msrb.mxu3 %v3153_v27  ;;  %v3176_v29 = vld [vmem:[%s4090_s16 + $0x78] sm:$0xff]  ;;  %2029 = vmatpush.bf16.msrb.mxu2 %v3168_v28  ;;  %v3189_v27 = vld [vmem:[%s4092_s18 + $0x20] sm:$0xff] }
 0x4ac   : > { %v3197_v28 = vld [vmem:[%s4092_s18 + $0x60] sm:$0xff] }
 0x4ad   : > { %1370 = vmatmul.bf16.vlgmr.msrb.gmra.mxu1 %v1257_v30  ;;  %v3184_v30 = vld [vmem:[%s4090_s16 + $0xb8] sm:$0xff] }
 0x4ae   : > { %2055 = vmatpush.bf16.msrb.mxu1 %v3184_v30  ;;  %v3188_v30 = vld [vmem:[%s4092_s18 + $0x18] sm:$0xff] }
 0x4b2   : > { %2056 = vmatpush.bf16.msrb.mxu1 %v3183_v33  ;;  %v3187_v33 = vld [vmem:[%s4092_s18 + $0x10] sm:$0xff] }
 0x4b6   : > { %2057 = vmatpush.bf16.msrb.mxu1 %v3182_v48 }
 0x4ba   : > { %2058 = vmatpush.bf16.msrb.mxu1 %v3181_v51 }
 0x4bd   : > { %v1384_v31 = vpop.f32.mrf.mxu3 }
 0x4be   : > { %2059 = vmatpush.bf16.msrb.mxu1 %v3180_v54 }
 0x4c5   : > { %v1386_v32 = vpop.f32.mrf.mxu3 }
 0x4c6   : > { %v3175_v32 = vld [vmem:[%s4090_s16 + $0x70] sm:$0xff] }
 0x52a   : > { %v1371_v46 = vpop.f32.mrf.mxu1 }
 0x52b   : > { %v1372_v47 = vadd.f32 %v3288_v44, %v1371_v46  ;;  %v3166_v46 = vld [vmem:[%s4090_s16 + $0x28] sm:$0xff] }
 0x52d   : > { %v1385_v49 = vadd.f32 %v1384_v31, %v1372_v47  ;;  %v3167_v31 = vld [vmem:[%s4090_s16 + $0x30] sm:$0xff]  ;;  %v3174_v47 = vld [vmem:[%s4090_s16 + $0x68] sm:$0xff] }
 0x52e   : > { %2030 = vmatpush.bf16.msrb.mxu2 %v3167_v31  ;;  %v3196_v31 = vld [vmem:[%s4092_s18 + $0x58] sm:$0xff] }
 0x52f   : > { %v1388_v50 = vadd.f32 %v1385_v49, %v3675_v60  ;;  %v3165_v49 = vld [vmem:[%s4090_s16 + $0x20] sm:$0xff] }
 0x531   : > { %v1389_v52 = vmax.f32 %v1388_v50, 0.0  ;;  %v3173_v50 = vld [vmem:[%s4090_s16 + $0x60] sm:$0xff] }
 0x532   : > { %v1373_v53 = vpop.f32.mrf.mxu1  ;;  %2031 = vmatpush.bf16.msrb.mxu2 %v3166_v46 }
 0x533   : > { %1390 = vst.msk [vmem:[#allocation7 + $0x1] sm:$0xff] %vm812_vm8, %v1389_v52  ;;  %v3164_v52 = vld [vmem:[%s4090_s16 + $0x18] sm:$0xff] }
 0x534   : > { %v3172_v53 = vld [vmem:[%s4090_s16 + $0x58] sm:$0xff] }
 0x536   : > { %2032 = vmatpush.bf16.msrb.mxu2 %v3165_v49 }
 0x53a   : > { %v1392_v55 = vld [vmem:[#allocation7 + $0x1] ss:$2 sm:$0xf]  ;;  %v1444_v56 = vld [vmem:[#allocation7 + $0x2] ss:$2 sm:$0xf]  ;;  %2033 = vmatpush.bf16.msrb.mxu2 %v3164_v52 }
 0x53b   : > { %1446 = vrot.lane.b32.xlu2 %v1392_v55, %s4133_s30  ;;  %v1393_v57 = vpack.c.bf16 %v1392_v55, %v1392_v55  ;;  %v1451_v58 = vpack.c.bf16 %v1444_v56, %v1444_v56  ;;  %v1442_v60 = vld [vmem:[#allocation7] ss:$2 sm:$0xf]  ;;  %s3315_s30 = scalar_lea.hbm %s4096_s22, 2 }
 0x53c   : > { %v3163_v55 = vld [vmem:[%s4090_s16 + $0x10] sm:$0xff]  ;;  %p3317_p1 = scmp.lt.s32.totalorder %s3315_s30, %s3311_s26 }
 0x53d   : > { %2700 = vmatmul.msk.bf16.vlgmr.msrb.gmra.mxu0 %vm812_vm8, %v1393_v57  ;;  %2749 = vmatmul.msk.bf16.vlgmr.msra.gmra.mxu3 %vm812_vm8, %v1451_v58  ;;  %v3171_v56 = vld [vmem:[%s4090_s16 + $0x50] sm:$0xff]  ;;  %v3162_v58 = vld [vmem:[%s4090_s16 + $0x8] sm:$0xff] }
 0x53e   : > { %2042 = vmatpush.bf16.msrb.mxu0 %v3176_v29  ;;  %v3179_v57 = vld [vmem:[%s4090_s16 + $0x90] sm:$0xff]  ;;  %2034 = vmatpush.bf16.msrb.mxu2 %v3163_v55  ;;  %v3205_v29 = vld [vmem:[%s4092_s18 + $0xa0] sm:$0xff]  ;;  %p3318_p2 = por %p3317_p1, %p3316_p0 }
 0x53f   : > { %2060 = vmatpush.bf16.msrb.mxu1 %v3179_v57  ;;  %2273 = vmatpush.bf16.msra.mxu3 %v3192_v0  ;;  %v3211_v0 = vld [vmem:[%s4094_s20 + $0x10] sm:$0xff] }
 0x540   : > { %p3319_p3 = pnand %p3318_p2, %p3314_p13 }
 0x542   : > { %2043 = vmatpush.bf16.msrb.mxu0 %v3175_v32  ;;  %2035 = vmatpush.bf16.msrb.mxu2 %v3162_v58  ;;  %v3204_v32 = vld [vmem:[%s4092_s18 + $0x98] sm:$0xff] }
 0x543   : > { %2274 = vmatpush.bf16.msra.mxu3 %v3191_v3 }
 0x546   : > { %2044 = vmatpush.bf16.msrb.mxu0 %v3174_v47 }
 0x547   : > { %2275 = vmatpush.bf16.msra.mxu3 %v3190_v25 }
 0x54a   : > { %2045 = vmatpush.bf16.msrb.mxu0 %v3173_v50 }
 0x54b   : > { %2276 = vmatpush.bf16.msra.mxu3 %v3189_v27 }
 0x54e   : > { %2046 = vmatpush.bf16.msrb.mxu0 %v3172_v53 }
 0x54f   : > { %2277 = vmatpush.bf16.msra.mxu3 %v3188_v30 }
 0x552   : > { %2047 = vmatpush.bf16.msrb.mxu0 %v3171_v56 }
 0x553   : > { %2278 = vmatpush.bf16.msra.mxu3 %v3187_v33 }
 0x556   : > { %2048 = vmatpush.bf16.msrb.mxu0 %v3170_v59  ;;  %v3216_v59 = vld [vmem:[%s4094_s20 + $0x38] sm:$0xff] }
 0x595   : > { %v1447_v61 = vpop.permute.xlu2 %1446 }
 0x596   : > { %v1449_v62 = vsel %vm812_vm8, %v1442_v60, %v1447_v61  ;;  %v3178_v60 = vld [vmem:[%s4090_s16 + $0x88] sm:$0xff]  ;;  %v3161_v61 = vld [vmem:[%s4090_s16] sm:$0xff] }
 0x597   : > { %v1450_v63 = vpack.c.bf16 %v1449_v62, %v1449_v62  ;;  %v3169_v62 = vld [vmem:[%s4090_s16 + $0x40] sm:$0xff]  ;;  %2061 = vmatpush.bf16.msrb.mxu1 %v3178_v60  ;;  %2036 = vmatpush.bf16.msrb.mxu2 %v3161_v61  ;;  %v3215_v60 = vld [vmem:[%s4094_s20 + $0x30] sm:$0xff]  ;;  %v3214_v61 = vld [vmem:[%s4094_s20 + $0x28] sm:$0xff] }
 0x598   : > { %2049 = vmatpush.bf16.msrb.mxu0 %v3169_v62  ;;  %v3213_v62 = vld [vmem:[%s4094_s20 + $0x20] sm:$0xff] }
 0x599   : > { %1563 = vmatmul.bf16.vlgmr.msra.gmra.mxu2 %v1450_v63  ;;  %v3177_v63 = vld [vmem:[%s4090_s16 + $0x80] sm:$0xff] }
 0x59b   : > { %2062 = vmatpush.bf16.msrb.mxu1 %v3177_v63  ;;  %2286 = vmatpush.bf16.msra.mxu2 %v3200_v1  ;;  %v3212_v63 = vld [vmem:[%s4094_s20 + $0x18] sm:$0xff]  ;;  %v3210_v1 = vld [vmem:[%s4094_s20 + $0x8] sm:$0xff] }
 0x59f   : > { %2287 = vmatpush.bf16.msra.mxu2 %v3199_v4  ;;  %v3365_v4 = vmov 4.0  }
 0x5a0   : > { %3293 = vrcp.f32 %v3365_v4 }
 0x5ba   : > { %v3820_v12 = vpop.f32.mrf.mxu0 }
 0x5c0   : > { %v1577_v13 = vpop.f32.mrf.mxu3 }
 0x5c2   : > { %v1440_v14 = vpop.f32.mrf.mxu0 }
 0x5c8   : > { %v1579_v15 = vpop.f32.mrf.mxu3 }
 0x61c   : > { %v1564_v35 = vpop.f32.mrf.mxu2 }
 0x61d   : > { %v1565_v36 = vadd.f32 %v3289_v34, %v1564_v35  ;;  %v3195_v34 = vld [vmem:[%s4092_s18 + $0x50] sm:$0xff] }
 0x61e   : > { %v3203_v35 = vld [vmem:[%s4092_s18 + $0x90] sm:$0xff] }
 0x61f   : > { %v1578_v37 = vadd.f32 %v1577_v13, %v1565_v36  ;;  %v3186_v36 = vld [vmem:[%s4092_s18 + $0x8] sm:$0xff] }
 0x620   : > { %2279 = vmatpush.bf16.msra.mxu3 %v3186_v36 }
 0x621   : > { %v1581_v38 = vmax.f32 %v1578_v37, 0.0  ;;  %v3194_v37 = vld [vmem:[%s4092_s18 + $0x48] sm:$0xff] }
 0x623   : > { %1582 = vst [vmem:[#allocation8 + $0x1] sm:$0xf] %v1581_v38  ;;  %v3202_v38 = vld [vmem:[%s4092_s18 + $0x88] sm:$0xff] }
 0x624   : > { %v1566_v39 = vpop.f32.mrf.mxu2 }
 0x625   : > { %v3185_v39 = vld [vmem:[%s4092_s18] sm:$0xff] }
 0x626   : > { %2280 = vmatpush.bf16.msra.mxu3 %v3185_v39 }
 0x62a   : > { %v1583_v40 = vld [vmem:[#allocation8] sm:$0xf] }
 0x62b   : > { %v1584_v41 = vld [vmem:[#allocation8 + $0x1] sm:$0xf]  ;;  %v1586_v43 = vpack.c.bf16 %v1583_v40, %v1583_v40 }
 0x62c   : > { %v1585_v42 = vld [vmem:[#allocation8 + $0x2] sm:$0xf]  ;;  %v1587_v44 = vpack.c.bf16 %v1584_v41, %v1584_v41 }
 0x62d   : > { %v1588_v45 = vpack.c.bf16 %v1585_v42, %v1585_v42  ;;  %1793 = vmatmul.bf16.vlgmr.msra.gmra.mxu0 %v1586_v43  ;;  %v3193_v40 = vld [vmem:[%s4092_s18 + $0x40] sm:$0xff] }
 0x62e   : > { %1806 = vmatmul.bf16.vlgmr.msra.gmra.mxu1 %v1587_v44  ;;  %2299 = vmatpush.bf16.msra.mxu0 %v3208_v2  ;;  %v3201_v41 = vld [vmem:[%s4092_s18 + $0x80] sm:$0xff] }
 0x62f   : > { %1819 = vmatmul.bf16.vlgmr.msrb.gmra.mxu3 %v1588_v45  ;;  %v3291_v44 = vld [vmem:[%s4091_s17] ss:$0 sm:$0xff]  ;;  %2396 = vmatpush.bf16.msra.mxu1 %v3216_v59 }
 0x630   : > { %v3209_v2 = vld [vmem:[%s4094_s20] sm:$0xff] }
 0x632   : > { %2300 = vmatpush.bf16.msra.mxu0 %v3207_v5  ;;  %v3292_v5 = vld [vmem:[%s4093_s19] ss:$0 sm:$0xff] }
 0x633   : > { %2397 = vmatpush.bf16.msra.mxu1 %v3215_v60 }
 0x636   : > { %2301 = vmatpush.bf16.msra.mxu0 %v3206_v26 }
 0x637   : > { %2398 = vmatpush.bf16.msra.mxu1 %v3214_v61 }
 0x63a   : > { %2302 = vmatpush.bf16.msra.mxu0 %v3205_v29 }
 0x63b   : > { %2399 = vmatpush.bf16.msra.mxu1 %v3213_v62 }
 0x63e   : > { %2303 = vmatpush.bf16.msra.mxu0 %v3204_v32  ;;  %v2347_v32 = vld [vmem:[%s4095_s21] sm:$0x1] }
 0x63f   : > { %2400 = vmatpush.bf16.msra.mxu1 %v3212_v63 }
 0x642   : > { %2304 = vmatpush.bf16.msra.mxu0 %v3203_v35 }
 0x643   : > { %2401 = vmatpush.bf16.msra.mxu1 %v3211_v0 }
 0x646   : > { %2305 = vmatpush.bf16.msra.mxu0 %v3202_v38 }
 0x647   : > { %2402 = vmatpush.bf16.msra.mxu1 %v3210_v1 }
 0x64a   : > { %2306 = vmatpush.bf16.msra.mxu0 %v3201_v41 }
 0x64b   : > { %2403 = vmatpush.bf16.msra.mxu1 %v3209_v2 }
 0x6aa   : > { %v1794_v7 = vpop.f32.mrf.mxu0 }
 0x6ab   : > { %v1807_v8 = vpop.f32.mrf.mxu1  ;;  %v1795_v9 = vadd.f32 %v3290_v6, %v1794_v7 }
 0x6ad   : > { %v1808_v10 = vadd.f32 %v1807_v8, %v1795_v9  ;;  %v3294_v9 = vpop.eup %3293 }
 0x6ae   : > { %vm2327_vm10 = vweird.f32 %v3294_v9 }
 0x6b2   : > { %v1820_v11 = vpop.f32.mrf.mxu3  ;;  %v1796_v14 = vpop.f32.mrf.mxu0 }
 0x6b3   : > { %v1821_v13 = vadd.f32 %v1820_v11, %v1808_v10  ;;  %v1809_v15 = vpop.f32.mrf.mxu1  ;;  %v2323_v14 = vmul.f32 4.0, %v3294_v9 }
 0x6b5   : > { %v1824_v16 = vadd.f32 %v1821_v13, %v3820_v12  ;;  %v3198_v12 = vld [vmem:[%s4092_s18 + $0x68] sm:$0xff] }
 0x6b6   : > { %2288 = vmatpush.bf16.msra.mxu2 %v3198_v12 }
 0x6b7   : > { %v1825_v17 = vmax.f32 %v1824_v16, 0.0 }
 0x6b9   : > { %1826 = vst [vmem:[#allocation9 + $0x1] sm:$0xf] %v1825_v17 }
 0x6ba   : > { %v1822_v18 = vpop.f32.mrf.mxu3  ;;  %2289 = vmatpush.bf16.msra.mxu2 %v3197_v28 }
 0x6be   : > { %2290 = vmatpush.bf16.msra.mxu2 %v3196_v31 }
 0x6c0   : > { %v1827_v19 = vld [vmem:[#allocation9] sm:$0xf] }
 0x6c1   : > { %v1828_v20 = vld [vmem:[#allocation9 + $0x1] sm:$0xf]  ;;  %v1830_v22 = vpack.c.bf16 %v1827_v19, %v1827_v19 }
 0x6c2   : > { %v1829_v21 = vld [vmem:[#allocation9 + $0x2] sm:$0xf]  ;;  %v1831_v23 = vpack.c.bf16 %v1828_v20, %v1828_v20  ;;  %2291 = vmatpush.bf16.msra.mxu2 %v3195_v34  ;;  %v2324_v20 = vsub.f32 1.0, %v2323_v14 }
 0x6c3   : > { %v1832_v24 = vpack.c.bf16 %v1829_v21, %v1829_v21  ;;  %2037 = vmatmul.bf16.vlgmr.msrb.gmra.mxu2 %v1830_v22  ;;  %v2070_v15 = vld [vmem:[#allocation9 + $0x1] sm:$0xf] }
 0x6c4   : > { %2050 = vmatmul.bf16.vlgmr.msrb.gmra.mxu0 %v1831_v23  ;;  %v2325_v23 = vmul.f32 %v3294_v9, %v2324_v20 }
 0x6c5   : > { %2063 = vmatmul.bf16.vlgmr.msrb.gmra.mxu1 %v1832_v24 }
 0x6c6   : > { %2292 = vmatpush.bf16.msra.mxu2 %v3194_v37  ;;  %v2326_v12 = vadd.f32 %v3294_v9, %v2325_v23 }
 0x6c8   : > { %v2328_v28 = vsel %vm2327_vm10, %v3294_v9, %v2326_v12 }
 0x6ca   : > { %2293 = vmatpush.bf16.msra.mxu2 %v3193_v40 }
 0x741   : > { %v2051_v42 = vpop.f32.mrf.mxu0 }
 0x742   : > { %v2064_v43 = vpop.f32.mrf.mxu1 }
 0x746   : > { %v2038_v45 = vpop.f32.mrf.mxu2 }
 0x747   : > { %v2039_v46 = vadd.f32 %v3291_v44, %v2038_v45 }
 0x749   : > { %v2053_v47 = vpop.f32.mrf.mxu0  ;;  %v2052_v48 = vadd.f32 %v2051_v42, %v2039_v46 }
 0x74a   : > { %v2066_v49 = vpop.f32.mrf.mxu1 }
 0x74b   : > { %v2065_v50 = vadd.f32 %v2064_v43, %v2052_v48 }
 0x74d   : > { %v2068_v51 = vmax.f32 %v2065_v50, 0.0 }
 0x74e   : > { %v2040_v52 = vpop.f32.mrf.mxu2 }
 0x74f   : > { %2069 = vst [vmem:[#allocation8 + $0x1] sm:$0xf] %v2068_v51 }
 0x756   : > { %v2071_v53 = vld [vmem:[#allocation8] sm:$0xf] }
 0x757   : > { %v2072_v54 = vld [vmem:[#allocation8 + $0x1] sm:$0xf]  ;;  %v2074_v56 = vpack.c.bf16 %v2071_v53, %v2071_v53 }
 0x758   : > { %v2073_v55 = vld [vmem:[#allocation8 + $0x2] sm:$0xf]  ;;  %v2075_v57 = vpack.c.bf16 %v2072_v54, %v2072_v54 }
 0x759   : > { %v2076_v58 = vpack.c.bf16 %v2073_v55, %v2073_v55  ;;  %2281 = vmatmul.bf16.vlgmr.msra.gmra.mxu3 %v2074_v56 }
 0x75a   : > { %2294 = vmatmul.bf16.vlgmr.msra.gmra.mxu2 %v2075_v57 }
 0x75b   : > { %2307 = vmatmul.bf16.vlgmr.msra.gmra.mxu0 %v2076_v58 }
 0x7d8   : > { %v2308_v3 = vpop.f32.mrf.mxu0 }
 0x7dc   : > { %v2282_v6 = vpop.f32.mrf.mxu3 }
 0x7dd   : > { %v2295_v7 = vpop.f32.mrf.mxu2  ;;  %v2283_v8 = vadd.f32 %v3292_v5, %v2282_v6 }
 0x7df   : > { %v2296_v10 = vadd.f32 %v2295_v7, %v2283_v8 }
 0x7e0   : > { %v2310_v11 = vpop.f32.mrf.mxu0 }
 0x7e1   : > { %v2309_v13 = vadd.f32 %v2308_v3, %v2296_v10 }
 0x7e3   : > { %v2312_v16 = vadd.f32 %v2309_v13, %v2070_v15 }
 0x7e4   : > { %v2284_v17 = vpop.f32.mrf.mxu3 }
 0x7e5   : > { %v2297_v18 = vpop.f32.mrf.mxu2  ;;  %v2313_v19 = vmax.f32 %v2312_v16, 0.0 }
 0x7e7   : > { %v2315_v21 = vsel %vm2314_vm9, %v2313_v19, 0.0 }
 0x7e8   : > { %v2316_v22 = vrot.slane %v2315_v21, 4 }
 0x7ea   : > { %v2317_v24 = vadd.f32 %v2316_v22, %v2315_v21 }
 0x7ec   : > { %v2318_v25 = vrot.slane %v2317_v24, 2 }
 0x7ee   : > { %v2319_v26 = vadd.f32 %v2318_v25, %v2317_v24 }
 0x7f0   : > { %v2320_v27 = vrot.slane %v2319_v26, 1 }
 0x7f2   : > { %v2321_v29 = vadd.f32 %v2320_v27, %v2319_v26 }
 0x7f4   : > { %v2329_v30 = vmul.f32 %v2328_v28, %v2321_v29 }
 0x7f6   : > { %v2330_v31 = vpack.c.bf16 %v2329_v30, %v2329_v30 }
 0x7f8   : > { %2404 = vmatmul.bf16.vlgmr.msra.gmra.mxu1 %v2330_v31 }
 0x875   : > { %v2405_v33 = vpop.f32.mrf.mxu1 }
 0x876   : > { %v2406_v34 = vadd.f32 %v2405_v33, %v2347_v32 }
 0x878   : > { %2409 = vst [vmem:[%s675_s25] sm:$0x1] %v2406_v34 }
 0x879   : > { %3322 = shalt.err (!%p3319_p3)
}
 0x87a   : > { %3218 = dma.vmem_to_hbm [thread:$0]  (%p3519_p5), %s2422_s2, 16, %s2424_s0, %s2411_s5  }
 0x87d   : > { %v2407_v35 = vpop.f32.mrf.mxu1 }
 0x87e PF: > { %s4136_s29 = sld [smem:[#allocation15_spill]] }
 0x87f   : > { %s4137_s27 = sld [smem:[#allocation13_spill]] }
 0x884   : > { %p3224_p4 = scmp.ge.s32.totalorder %s4136_s29, 2 }
 0x885   : > { %s2435_s7 = sand.u32 1, %s4137_s27  }
 0x886   : > { %p3221_p7 = pnand %p3224_p4, %p3523_p6  ;;  %s2436_s4 = scalar_lea.sflag [#allocation11], %s2435_s7 }
 0x888   : > { %p3222_p8 = pneg %p3221_p7 }
 0x88a   : > { %3340 = dma.done.wait (%p3222_p8), %s2436_s4, 16  }
 0x88b   : > { %3342 = vsyncadd (%p3222_p8), %s2436_s4, 4294967280  ;;  %s4139_s30 = sld [smem:[#allocation16_spill]]  ;;  %s4142_s3 = smov %s3349_s28 }
 0x88c   : > { %s4140_s24 = sld [smem:[#allocation14_spill]] }
 0x88d   : > { %s4141_s29 = sld [smem:[#allocation17_spill]] }
 0x891   : > { %p32_p9 = scmp.ge.s32.totalorder %s4139_s30, 4  }
 0x892   : > { %s4143_s28 = smov %s4140_s24 }
 0x893   :  { %34 = sbr.rel (!%p32_p9) target bundleno = 12 (0xc), region = 156 }
 0x898   :  { %2441 = vsyncpa [#allocation11], 1 }
 0x899   :  { %2443 = vsyncpa [#allocation11 + $0x1], 1 }

</bundles_post_ra>
